<compile_context>
chip_gen: v7x
topology: tpu7x:2x2x1
jax: 0.10.0
libtpu: 0.0.40
codegen_flags: <defaults>
</compile_context>

<pallas_src>
import functools

import jax
import jax.numpy as jnp
from jax import lax
from jax.experimental import pallas as pl
from jax.experimental.pallas import tpu as pltpu


def _round_up(x, m):
    return (x + m - 1) // m * m


def _grouped_first_argmax_onehot(logits, group_size):
    """One-hot of the argmax within contiguous lane groups (first occurrence).

    logits: (R, L) float32 with L a multiple of `group_size` (a power of two).
    Lane l is set iff logits[l] > every strictly-earlier lane of its group and
    >= every later lane (== torch.argmax first-occurrence tie-breaking).
    Implemented as masked Hillis-Steele prefix/suffix max scans with
    pltpu.roll so the work stays on full-width lane vectors (XLU + VPU).
    """
    _, L = logits.shape
    neg = float("-inf")
    lane = lax.broadcasted_iota(jnp.int32, logits.shape, 1)
    pos = lane & (group_size - 1)  # position within the group (power-of-two C)

    # Exclusive prefix max over strictly-earlier lanes of the group.
    pmax = jnp.where(pos >= 1, pltpu.roll(logits, 1, 1), neg)
    s = 1
    while s < group_size - 1:
        pmax = jnp.maximum(pmax, jnp.where(pos >= s, pltpu.roll(pmax, s, 1), neg))
        s *= 2

    # Exclusive suffix max over strictly-later lanes of the group.
    smax = jnp.where(pos < group_size - 1, pltpu.roll(logits, L - 1, 1), neg)
    s = 1
    while s < group_size - 1:
        smax = jnp.maximum(
            smax, jnp.where(pos + s < group_size, pltpu.roll(smax, L - s, 1), neg))
        s *= 2

    hit = jnp.logical_and(logits > pmax, logits >= smax)
    return jnp.where(hit, 1.0, 0.0)


def _gating_kernel_packed(x_ref, w_ref, b_ref, o_ref, *, group_size, precision):
    # fc: packed logits = x_packed @ W_packed + b_packed.  RHS is contracted on
    # its major dim (pre-packed in the wrapper), f32 accumulation on the MXU.
    logits = lax.dot_general(
        x_ref[...], w_ref[...],
        dimension_numbers=(((1,), (0,)), ((), ())),
        preferred_element_type=jnp.float32,
        precision=precision)
    logits = logits + b_ref[...].astype(jnp.float32)
    # onehot_argmax_for_imle, applied per lane-group of `group_size` classes.
    o_ref[...] = _grouped_first_argmax_onehot(logits, group_size).astype(o_ref.dtype)


def _gating_kernel_rowwise(x_ref, wt_ref, b_ref, o_ref, *, precision):
    # Fallback (num_choices not a power of two): one token per row, C lanes.
    logits = lax.dot_general(
        x_ref[...], wt_ref[...],
        dimension_numbers=(((1,), (0,)), ((), ())),
        preferred_element_type=jnp.float32,
        precision=precision)
    logits = logits + b_ref[...].astype(jnp.float32)
    idx = jnp.argmax(logits, axis=-1, keepdims=True).astype(jnp.int32)
    iota = lax.broadcasted_iota(jnp.int32, logits.shape, 1)
    o_ref[...] = (iota == idx).astype(o_ref.dtype)


def _forward_packed(x2, w, b, out_dtype, tm, precision):
    N, H = x2.shape
    C = w.shape[0]
    P = 128 // C          # tokens packed per 128-lane row
    K = P * H

    # --- wrapper-side lane packing (contiguous row-major, fuses under jit) ---
    n_tok = _round_up(N, P)
    if n_tok != N:
        x2 = jnp.pad(x2, ((0, n_tok - N), (0, 0)))
    xp = x2.reshape(n_tok // P, K)
    rp = xp.shape[0]

    # Block-diagonal packed weight (K, P*C) = kron(I_P, W^T), built once so the
    # kernel's RHS is already transposed/packed (no per-step relayout).
    wp = jnp.kron(jnp.eye(P, dtype=w.dtype), jnp.transpose(w))
    bp = jnp.tile(b.reshape(1, C), (1, P))

    # --- row tiling: big tiles amortize per-step overhead (HBM-bound kernel) --
    tr = min(max(8, tm // P), _round_up(rp, 8))
    # 2-way split only when each half keeps >= ~8k tokens (v7x megacore);
    # single-TC v5e/v6e would just pay an extra grid step otherwise.
    if n_tok >= 2 * 8192:
        tr = min(tr, _round_up(pl.cdiv(rp, 2), 8))
    tr = _round_up(tr, 8)
    rp_pad = _round_up(rp, tr)
    if rp_pad != rp:
        xp = jnp.pad(xp, ((0, rp_pad - rp), (0, 0)))

    kernel = functools.partial(
        _gating_kernel_packed, group_size=C, precision=precision)
    out = pl.pallas_call(
        kernel,
        out_shape=jax.ShapeDtypeStruct((rp_pad, P * C), out_dtype),
        grid_spec=pltpu.PrefetchScalarGridSpec(
            num_scalar_prefetch=0,
            grid=(rp_pad // tr,),
            in_specs=[
                pl.BlockSpec((tr, K), lambda i: (i, 0)),      # packed x rows
                pl.BlockSpec((K, P * C), lambda i: (0, 0)),   # packed weight (invariant)
                pl.BlockSpec((1, P * C), lambda i: (0, 0)),   # packed bias  (invariant)
            ],
            out_specs=pl.BlockSpec((tr, P * C), lambda i: (i, 0)),
        ),
        compiler_params=pltpu.CompilerParams(
            dimension_semantics=("parallel",),
            vmem_limit_bytes=32 * 1024 * 1024,
        ),
    )(xp, wp, bp)
    # (rp_pad, P*C) -> (rp_pad*P, C): contiguous unpack back to token-major rows.
    return out.reshape(rp_pad * P, C)


def _forward_rowwise(x2, w, b, out_dtype, tm, precision):
    N, H = x2.shape
    C = w.shape[0]
    wt = jnp.transpose(w)            # (H, C): contract RHS on its major dim
    b2 = b.reshape(1, C)
    tm_eff = max(8, min(_round_up(tm, 8), _round_up(N, 8)))
    n_pad = _round_up(N, tm_eff)
    if n_pad != N:
        x2 = jnp.pad(x2, ((0, n_pad - N), (0, 0)))
    kernel = functools.partial(_gating_kernel_rowwise, precision=precision)
    out = pl.pallas_call(
        kernel,
        out_shape=jax.ShapeDtypeStruct((n_pad, C), out_dtype),
        grid_spec=pltpu.PrefetchScalarGridSpec(
            num_scalar_prefetch=0,
            grid=(n_pad // tm_eff,),
            in_specs=[
                pl.BlockSpec((tm_eff, H), lambda i: (i, 0)),
                pl.BlockSpec((H, C), lambda i: (0, 0)),
                pl.BlockSpec((1, C), lambda i: (0, 0)),
            ],
            out_specs=pl.BlockSpec((tm_eff, C), lambda i: (i, 0)),
        ),
        compiler_params=pltpu.CompilerParams(
            dimension_semantics=("parallel",),
            vmem_limit_bytes=32 * 1024 * 1024,
        ),
    )(x2, wt, b2)
    return out


def aimle_gating_forward(x, w, b, *, tm=32768, gate_dtype=None):
    """Eval-mode AIMLEGatingNetwork forward: one_hot(argmax(x @ W^T + b)).

    x: (..., H); w: (C, H) (nn.Linear storage layout); b: (C,) or (1, C).
    gate_dtype optionally overrides the output dtype (defaults to x.dtype,
    matching torch's `.to(input_type)`); 0/1 gates are exact in bf16/int8.
    """
    orig_shape = x.shape
    H = orig_shape[-1]
    C = w.shape[0]
    out_dtype = x.dtype if gate_dtype is None else gate_dtype
    x2 = x.reshape(-1, H)
    N = x2.shape[0]
    # f32 inputs: full-precision MXU passes so near-tie argmax matches an f32
    # reference / the torch module; the matmul stays off the critical path.
    precision = lax.Precision.HIGHEST if x2.dtype == jnp.float32 else None

    if C <= 128 and (C & (C - 1)) == 0:
        out = _forward_packed(x2, w, b, out_dtype, tm, precision)
    else:
        # Non-power-of-two num_choices: un-packed (narrow-lane) kernel.
        out = _forward_rowwise(x2, w, b, out_dtype, tm, precision)
    # TODO(synk): training-mode aimle() perturbation / TargetDistribution
    # straight-through gradient is a custom-VJP concern; only the hard top-1
    # forward value lives here (identical to the eval path's value).
    return out[:N].reshape(*orig_shape[:-1], C)


def _onehot_ref(x, w, b):
    logits = jnp.einsum("...h,ch->...c", x, w,
                        precision=lax.Precision.HIGHEST) + b.reshape(-1)
    return jax.nn.one_hot(jnp.argmax(logits, axis=-1), w.shape[0], dtype=x.dtype)


if __name__ == "__main__":
    hidden_dim = 32
    num_choices = 8
    batch, seq = 2, 8

    key = jax.random.PRNGKey(0)
    kx, kw, kb, kx2, kx3 = jax.random.split(key, 5)

    # Deterministic synthetic parameters (nn.Linear(hidden_dim, num_choices)).
    x = jax.random.normal(kx, (batch, seq, hidden_dim), dtype=jnp.float32)
    bound = 1.0 / (hidden_dim ** 0.5)
    w = jax.random.uniform(kw, (num_choices, hidden_dim), jnp.float32,
                           minval=-bound, maxval=bound)
    b = jax.random.uniform(kb, (1, num_choices), jnp.float32,
                           minval=-bound, maxval=bound)

    out = jax.block_until_ready(aimle_gating_forward(x, w, b))
    ref = _onehot_ref(x, w, b)
    assert out.shape == (batch, seq, num_choices)
    assert out.dtype == x.dtype
    assert jnp.allclose(out, ref)
    assert jnp.allclose(out.sum(-1), 1.0)

    # Ragged row count (N=15) exercises the token/row padding path.
    x_odd = jax.random.normal(kx2, (5, 3, hidden_dim), dtype=jnp.float32)
    out_odd = jax.block_until_ready(aimle_gating_forward(x_odd, w, b))
    ref_odd = _onehot_ref(x_odd, w, b)
    assert out_odd.shape == (5, 3, num_choices)
    assert jnp.allclose(out_odd, ref_odd)
    assert jnp.allclose(out_odd.sum(-1), 1.0)

    # Exact-tie check: classes 1 and 3 share identical weights/bias, so their
    # logits tie bit-exactly; torch.argmax (and this kernel) must pick class 1.
    w_tie = w.at[3].set(w[1])
    b_tie = b.at[0, 3].set(b[0, 1])
    x_tie = jax.random.normal(kx3, (4, 8, hidden_dim), dtype=jnp.float32)
    out_tie = jax.block_until_ready(aimle_gating_forward(x_tie, w_tie, b_tie))
    ref_tie = _onehot_ref(x_tie, w_tie, b_tie)
    assert jnp.allclose(out_tie, ref_tie)
    assert not bool(jnp.any(out_tie[..., 3] > 0))
    assert jnp.allclose(out_tie.sum(-1), 1.0)

    print("KERNEL_OK")
</pallas_src>

<mosaic_0001>
module attributes {stable_mosaic.version = 11 : i64} {
  func.func @_gating_kernel_packed(%arg0: i32, %arg1: memref<8x512xf32, #tpu.memory_space<vmem>>, %arg2: memref<512x128xf32, #tpu.memory_space<vmem>>, %arg3: memref<1x128xf32, #tpu.memory_space<vmem>>, %arg4: memref<8x128xf32, #tpu.memory_space<vmem>>) attributes {dimension_semantics = [#tpu.dimension_semantics<parallel>], iteration_bounds = array<i64: 1>, scalar_prefetch = 0 : i64, scratch_operands = 0 : i64, tpu.core_type = #tpu.core_type<tc>, window_params = [{transform_indices = @transform_0, window_bounds = array<i64: 8, 512>}, {pipeline_mode = #tpu.pipeline_mode<synchronous>, transform_indices = @transform_1, window_bounds = array<i64: 512, 128>}, {pipeline_mode = #tpu.pipeline_mode<synchronous>, transform_indices = @transform_2, window_bounds = array<i64: 1, 128>}, {transform_indices = @transform_3, window_bounds = array<i64: 8, 128>}]} {
    %c0 = arith.constant 0 : index
    %c0_0 = arith.constant 0 : index
    %0 = vector.load %arg1[%c0, %c0_0] : memref<8x512xf32, #tpu.memory_space<vmem>>, vector<8x512xf32>
    %c0_1 = arith.constant 0 : index
    %c0_2 = arith.constant 0 : index
    %1 = vector.load %arg2[%c0_1, %c0_2] : memref<512x128xf32, #tpu.memory_space<vmem>>, vector<512x128xf32>
    %cst = arith.constant dense<0.000000e+00> : vector<8x128xf32>
    %2 = tpu.matmul %0, %1, %cst {dimension_numbers = #tpu.dot_dimension_numbers<[1], [0], [0], [1], [0, 0, 1, 1], [], []>, precision = #tpu.contract_precision<fp32>} : vector<8x512xf32>, vector<512x128xf32>, vector<8x128xf32> -> vector<8x128xf32>
    %c0_3 = arith.constant 0 : index
    %c0_4 = arith.constant 0 : index
    %3 = vector.load %arg3[%c0_3, %c0_4] : memref<1x128xf32, #tpu.memory_space<vmem>>, vector<1x128xf32>
    %4 = vector.broadcast %3 : vector<1x128xf32> to vector<8x128xf32>
    %5 = arith.addf %2, %4 : vector<8x128xf32>
    %6 = tpu.iota {dimensions = array<i32: 1>} : vector<8x128xi32>
    %c7_i32 = arith.constant 7 : i32
    %7 = vector.broadcast %c7_i32 : i32 to vector<8x128xi32>
    %8 = arith.andi %6, %7 : vector<8x128xi32>
    %c1_i32 = arith.constant 1 : i32
    %9 = vector.broadcast %c1_i32 : i32 to vector<8x128xi32>
    %10 = arith.cmpi sge, %8, %9 : vector<8x128xi32>
    %c1_i32_5 = arith.constant 1 : i32
    %11 = tpu.dynamic_rotate %5 by %c1_i32_5 dim 1 : vector<8x128xf32>, i32 -> vector<8x128xf32>
    %cst_6 = arith.constant 0xFF800000 : f32
    %12 = vector.broadcast %cst_6 : f32 to vector<8x128xf32>
    %13 = arith.select %10, %11, %12 : vector<8x128xi1>, vector<8x128xf32>
    %c1_i32_7 = arith.constant 1 : i32
    %14 = vector.broadcast %c1_i32_7 : i32 to vector<8x128xi32>
    %15 = arith.cmpi sge, %8, %14 : vector<8x128xi32>
    %c1_i32_8 = arith.constant 1 : i32
    %16 = tpu.dynamic_rotate %13 by %c1_i32_8 dim 1 : vector<8x128xf32>, i32 -> vector<8x128xf32>
    %cst_9 = arith.constant 0xFF800000 : f32
    %17 = vector.broadcast %cst_9 : f32 to vector<8x128xf32>
    %18 = arith.select %15, %16, %17 : vector<8x128xi1>, vector<8x128xf32>
    %19 = arith.maximumf %13, %18 : vector<8x128xf32>
    %c2_i32 = arith.constant 2 : i32
    %20 = vector.broadcast %c2_i32 : i32 to vector<8x128xi32>
    %21 = arith.cmpi sge, %8, %20 : vector<8x128xi32>
    %c2_i32_10 = arith.constant 2 : i32
    %22 = tpu.dynamic_rotate %19 by %c2_i32_10 dim 1 : vector<8x128xf32>, i32 -> vector<8x128xf32>
    %cst_11 = arith.constant 0xFF800000 : f32
    %23 = vector.broadcast %cst_11 : f32 to vector<8x128xf32>
    %24 = arith.select %21, %22, %23 : vector<8x128xi1>, vector<8x128xf32>
    %25 = arith.maximumf %19, %24 : vector<8x128xf32>
    %c4_i32 = arith.constant 4 : i32
    %26 = vector.broadcast %c4_i32 : i32 to vector<8x128xi32>
    %27 = arith.cmpi sge, %8, %26 : vector<8x128xi32>
    %c4_i32_12 = arith.constant 4 : i32
    %28 = tpu.dynamic_rotate %25 by %c4_i32_12 dim 1 : vector<8x128xf32>, i32 -> vector<8x128xf32>
    %cst_13 = arith.constant 0xFF800000 : f32
    %29 = vector.broadcast %cst_13 : f32 to vector<8x128xf32>
    %30 = arith.select %27, %28, %29 : vector<8x128xi1>, vector<8x128xf32>
    %31 = arith.maximumf %25, %30 : vector<8x128xf32>
    %c7_i32_14 = arith.constant 7 : i32
    %32 = vector.broadcast %c7_i32_14 : i32 to vector<8x128xi32>
    %33 = arith.cmpi slt, %8, %32 : vector<8x128xi32>
    %c127_i32 = arith.constant 127 : i32
    %34 = tpu.dynamic_rotate %5 by %c127_i32 dim 1 : vector<8x128xf32>, i32 -> vector<8x128xf32>
    %cst_15 = arith.constant 0xFF800000 : f32
    %35 = vector.broadcast %cst_15 : f32 to vector<8x128xf32>
    %36 = arith.select %33, %34, %35 : vector<8x128xi1>, vector<8x128xf32>
    %c1_i32_16 = arith.constant 1 : i32
    %37 = vector.broadcast %c1_i32_16 : i32 to vector<8x128xi32>
    %38 = arith.addi %8, %37 : vector<8x128xi32>
    %c8_i32 = arith.constant 8 : i32
    %39 = vector.broadcast %c8_i32 : i32 to vector<8x128xi32>
    %40 = arith.cmpi slt, %38, %39 : vector<8x128xi32>
    %c127_i32_17 = arith.constant 127 : i32
    %41 = tpu.dynamic_rotate %36 by %c127_i32_17 dim 1 : vector<8x128xf32>, i32 -> vector<8x128xf32>
    %cst_18 = arith.constant 0xFF800000 : f32
    %42 = vector.broadcast %cst_18 : f32 to vector<8x128xf32>
    %43 = arith.select %40, %41, %42 : vector<8x128xi1>, vector<8x128xf32>
    %44 = arith.maximumf %36, %43 : vector<8x128xf32>
    %c2_i32_19 = arith.constant 2 : i32
    %45 = vector.broadcast %c2_i32_19 : i32 to vector<8x128xi32>
    %46 = arith.addi %8, %45 : vector<8x128xi32>
    %c8_i32_20 = arith.constant 8 : i32
    %47 = vector.broadcast %c8_i32_20 : i32 to vector<8x128xi32>
    %48 = arith.cmpi slt, %46, %47 : vector<8x128xi32>
    %c126_i32 = arith.constant 126 : i32
    %49 = tpu.dynamic_rotate %44 by %c126_i32 dim 1 : vector<8x128xf32>, i32 -> vector<8x128xf32>
    %cst_21 = arith.constant 0xFF800000 : f32
    %50 = vector.broadcast %cst_21 : f32 to vector<8x128xf32>
    %51 = arith.select %48, %49, %50 : vector<8x128xi1>, vector<8x128xf32>
    %52 = arith.maximumf %44, %51 : vector<8x128xf32>
    %c4_i32_22 = arith.constant 4 : i32
    %53 = vector.broadcast %c4_i32_22 : i32 to vector<8x128xi32>
    %54 = arith.addi %8, %53 : vector<8x128xi32>
    %c8_i32_23 = arith.constant 8 : i32
    %55 = vector.broadcast %c8_i32_23 : i32 to vector<8x128xi32>
    %56 = arith.cmpi slt, %54, %55 : vector<8x128xi32>
    %c124_i32 = arith.constant 124 : i32
    %57 = tpu.dynamic_rotate %52 by %c124_i32 dim 1 : vector<8x128xf32>, i32 -> vector<8x128xf32>
    %cst_24 = arith.constant 0xFF800000 : f32
    %58 = vector.broadcast %cst_24 : f32 to vector<8x128xf32>
    %59 = arith.select %56, %57, %58 : vector<8x128xi1>, vector<8x128xf32>
    %60 = arith.maximumf %52, %59 : vector<8x128xf32>
    %61 = arith.cmpf ogt, %5, %31 : vector<8x128xf32>
    %62 = arith.cmpf oge, %5, %60 : vector<8x128xf32>
    %63 = arith.andi %61, %62 : vector<8x128xi1>
    %cst_25 = arith.constant 1.000000e+00 : f32
    %cst_26 = arith.constant 0.000000e+00 : f32
    %64 = vector.broadcast %cst_25 : f32 to vector<8x128xf32>
    %65 = vector.broadcast %cst_26 : f32 to vector<8x128xf32>
    %66 = arith.select %63, %64, %65 : vector<8x128xi1>, vector<8x128xf32>
    %c0_27 = arith.constant 0 : index
    %c0_28 = arith.constant 0 : index
    %67 = vector.load %arg4[%c0_27, %c0_28] : memref<8x128xf32, #tpu.memory_space<vmem>>, vector<8x128xf32>
    tpu.vector_store %arg4[%c0_27, %c0_28], %66 {strides = array<i32>} : memref<8x128xf32, #tpu.memory_space<vmem>>, vector<8x128xf32>,
    return
  }
  func.func @transform_0(%arg0: i32) -> (i32, i32) {
    %c0_i32 = arith.constant 0 : i32
    %c0_i32_0 = arith.constant 0 : i32
    return %arg0, %c0_i32 : i32, i32
  }
  func.func @transform_1(%arg0: i32) -> (i32, i32) {
    %c0_i32 = arith.constant 0 : i32
    %c0_i32_0 = arith.constant 0 : i32
    %c0_i32_1 = arith.constant 0 : i32
    return %c0_i32, %c0_i32_0 : i32, i32
  }
  func.func @transform_2(%arg0: i32) -> (i32, i32) {
    %c0_i32 = arith.constant 0 : i32
    %c0_i32_0 = arith.constant 0 : i32
    %c0_i32_1 = arith.constant 0 : i32
    return %c0_i32, %c0_i32_0 : i32, i32
  }
  func.func @transform_3(%arg0: i32) -> (i32, i32) {
    %c0_i32 = arith.constant 0 : i32
    %c0_i32_0 = arith.constant 0 : i32
    return %arg0, %c0_i32 : i32, i32
  }
}

</mosaic_0001>

<bundles_post_ra>
// kernel: tpu_custom_call.1
= control target key start
LH: loop header
LB: loop body
LE: loop exit
PB: predicated region body
PF: predicated region fallthrough
CT: control target
= control target key end

     0   :  { %8 = vsyncpa [#allocation3], 0  ;;  %s3740_s0 = inlined_call_operand.hbm [shape: f32[8,512], index: 0, kind: input, shape index: {}]   ;;  %s3741_s1 = inlined_call_operand.hbm [shape: f32[512,128], index: 1, kind: input, shape index: {}]   ;;  %s3742_s2 = inlined_call_operand.vmem [shape: f32[1,128], index: 2, kind: input, shape index: {}]   ;;  %s3743_s3 = inlined_call_operand.hbm [shape: f32[8,128], index: 3, kind: output, shape index: {}]  }
   0x1   :  { %9 = vsyncpa [#allocation6], 0 }
   0x2   :  { %10 = vsyncpa [#allocation4], 0  ;;  %s2793_s12 = smov [#allocation2]   ;;  %s2794_s14 = smov [#allocation5]  }
   0x3   :  { %s17_s13 = sshll.u32 %s2793_s12, 4  ;;  %s26_s15 = sshll.u32 %s2794_s14, 4  ;;  %s18_s13 = int_to_ptr.vmem [resolvable:$true] %s17_s13  ;;  %s2825_s15 = int_to_ptr.vmem [resolvable:$true] %s26_s15 }
   0x4   :  { %s2721_s18 = scalar_lea.hbm %s3740_s0, 512 }
   0x5   :  { %p2722_p0 = scmp.ne.s32.totalorder %s3740_s0, %s2721_s18  ;;  %p2725_p1 = scmp.lt.u32.totalorder %s2721_s18, %s3740_s0 }
   0x7   :  { %p2727_p2 = pnand %p2725_p1, %p2722_p0 }
   0x9   :  { %2730 = shalt.err (!%p2727_p2)
}
   0xa   :  { %s2731_s23 = scalar_lea.vmem %s18_s13, 512  ;;  %p2736_p4 = scmp.lt.s32.totalorder %s18_s13, %s18_s13 }
   0xb   :  { %p2732_p3 = scmp.ne.s32.totalorder %s18_s13, %s2731_s23  ;;  %p2737_p5 = scmp.lt.s32.totalorder %s2731_s23, %s2731_s23 }
   0xd   :  { %p2738_p6 = por %p2737_p5, %p2736_p4 }
   0xf   :  { %p2739_p7 = pnand %p2738_p6, %p2732_p3 }
  0x11   :  { %2742 = shalt.err (!%p2739_p7)
}
  0x12   :  { %20 = dma.hbm_to_vmem [thread:$0]  %s3740_s0, 512, %s18_s13, [#allocation3]  }
  0x13   :  { %s2743_s28 = scalar_lea.hbm %s3741_s1, 8192 }
  0x14   :  { %p2744_p8 = scmp.ne.s32.totalorder %s3741_s1, %s2743_s28  ;;  %p2747_p9 = scmp.lt.u32.totalorder %s2743_s28, %s3741_s1 }
  0x16   :  { %p2749_p10 = pnand %p2747_p9, %p2744_p8 }
  0x18   :  { %2752 = shalt.err (!%p2749_p10)
}
  0x19   :  { %s2753_s6 = scalar_lea.vmem %s2825_s15, 8192  ;;  %p2758_p12 = scmp.lt.s32.totalorder %s2825_s15, %s2825_s15 }
  0x1a   :  { %p2754_p11 = scmp.ne.s32.totalorder %s2825_s15, %s2753_s6  ;;  %p2759_p13 = scmp.lt.s32.totalorder %s2753_s6, %s2753_s6 }
  0x1c   :  { %p2760_p0 = por %p2759_p13, %p2758_p12 }
  0x1e   :  { %p2761_p1 = pnand %p2760_p0, %p2754_p11 }
  0x20   :  { %2764 = shalt.err (!%p2761_p1)
}
  0x21   :  { %s2795_s0 = smov 128   ;;  %s2796_s7 = smov 8  }
  0x22   :  { %32 = dma.hbm_to_vmem [thread:$0]  %s3741_s1, 8192, %s2825_s15, [#allocation6], %s2795_s0, %s2795_s0, %s2796_s7  }
  0x23   :  { %2787 = dma.done.wait [#allocation3], 512  }
  0x24   :  { %2788 = vsyncadd [#allocation3], 4294966784 }
  0x25   :  { %2789 = dma.done.wait [#allocation6], 8192  }
  0x26   :  { %2790 = vsyncadd [#allocation6], 4294959104  ;;  %v61_v0 = vld [vmem:[#allocation5 + $0x80] sm:$0xff]  ;;  %v62_v1 = vld [vmem:[#allocation5 + $0x88] sm:$0xff]  ;;  %s2798_s11 = smov 127   ;;  %s2799_s12 = smov 2  }
  0x27   :  { %v45_v2 = vld [vmem:[#allocation5] sm:$0xff]  ;;  %v165_v3 = vand.u32 4294901760, %v61_v0  ;;  %v168_v4 = vand.u32 4294901760, %v62_v1  ;;  %v46_v5 = vld [vmem:[#allocation5 + $0x8] sm:$0xff]  ;;  %v63_v7 = vld [vmem:[#allocation5 + $0x90] sm:$0xff]  ;;  %s2800_s13 = smov 126  }
  0x28   :  { %v117_v6 = vand.u32 4294901760, %v45_v2  ;;  %v64_v8 = vld [vmem:[#allocation5 + $0x98] sm:$0xff]  ;;  %v120_v9 = vand.u32 4294901760, %v46_v5  ;;  %v171_v10 = vand.u32 4294901760, %v63_v7  ;;  %v47_v12 = vld [vmem:[#allocation5 + $0x10] sm:$0xff]  ;;  %v65_v18 = vld [vmem:[#allocation5 + $0xa0] sm:$0xff] }
  0x29   :  { %v174_v11 = vand.u32 4294901760, %v64_v8  ;;  %v48_v13 = vld [vmem:[#allocation5 + $0x18] sm:$0xff]  ;;  %v2856_v14 = vpack.c.bf16 %v168_v4, %v165_v3  ;;  %v123_v16 = vand.u32 4294901760, %v47_v12  ;;  %v66_v19 = vld [vmem:[#allocation5 + $0xa8] sm:$0xff]  ;;  %v49_v23 = vld [vmem:[#allocation5 + $0x20] sm:$0xff]  ;;  %v177_v29 = vand.u32 4294901760, %v65_v18 }
  0x2a   :  { %v2858_v15 = vsub.f32 %v45_v2, %v117_v6  ;;  %v126_v17 = vand.u32 4294901760, %v48_v13  ;;  %v2860_v20 = vpack.c.bf16 %v120_v9, %v117_v6  ;;  %v2862_v21 = vsub.f32 %v46_v5, %v120_v9  ;;  %v50_v24 = vld [vmem:[#allocation5 + $0x28] sm:$0xff]  ;;  %v67_v37 = vld [vmem:[#allocation5 + $0xb0] sm:$0xff]  ;;  %v68_v42 = vld [vmem:[#allocation5 + $0xb8] sm:$0xff]  ;;  %s2801_s14 = smov 4   ;;  %s2802_s15 = smov 124  }
  0x2b   :  { %v2864_v22 = vpack.c.bf16 %v174_v11, %v171_v10  ;;  %2326 = vmatprep.subr.bf16.mxu0 %v2856_v14  ;;  %v2867_v25 = vsub.f32 %v63_v7, %v171_v10  ;;  %v2869_v26 = vsub.f32 %v64_v8, %v174_v11  ;;  %v2873_v28 = vsub.f32 %v47_v12, %v123_v16  ;;  %v51_v55 = vld [vmem:[#allocation5 + $0x30] sm:$0xff]  ;;  %v52_v56 = vld [vmem:[#allocation5 + $0x38] sm:$0xff]  ;;  %v69_v5 = vld [vmem:[#allocation5 + $0xc0] sm:$0xff]  ;;  %s2803_s16 = smov [#allocation7]  }
  0x2c   :  { %v2871_v27 = vpack.c.bf16 %v126_v17, %v123_v16  ;;  %2328 = vmatpush3.bf16.msra.mxu0 %v2860_v20  ;;  %v180_v30 = vand.u32 4294901760, %v66_v19  ;;  %v2876_v31 = vsub.f32 %v61_v0, %v165_v3  ;;  %v2878_v32 = vsub.f32 %v62_v1, %v168_v4  ;;  %v70_v6 = vld [vmem:[#allocation5 + $0xc8] sm:$0xff]  ;;  %v53_v11 = vld [vmem:[#allocation5 + $0x40] sm:$0xff]  ;;  %s1894_s17 = sshll.u32 %s2803_s16, 4  ;;  %s1895_s17 = int_to_ptr.vmem [resolvable:$true] %s1894_s17 }
  0x2d   :  { %2330 = vmatprep.subr.bf16.mxu0 %v2864_v22  ;;  %v129_v33 = vand.u32 4294901760, %v49_v23  ;;  %v132_v34 = vand.u32 4294901760, %v50_v24  ;;  %v3759_v35 = vand.u32 4294901760, %v2858_v15  ;;  %v3758_v36 = vand.u32 4294901760, %v2862_v21  ;;  %s2765_s18 = scalar_lea.vmem %s1895_s17, 128  ;;  %p2770_p3 = scmp.lt.s32.totalorder %s1895_s17, %s1895_s17 }
  0x2e   :  { %v2883_v38 = vsub.f32 %v48_v13, %v126_v17  ;;  %v2885_v39 = vpack.c.bf16 %v180_v30, %v177_v29  ;;  %v2887_v40 = vsub.f32 %v65_v18, %v177_v29  ;;  %v3763_v41 = vand.u32 4294901760, %v2876_v31  ;;  %v54_v29 = vld [vmem:[#allocation5 + $0x48] sm:$0xff]  ;;  %p2766_p2 = scmp.ne.s32.totalorder %s1895_s17, %s2765_s18  ;;  %p2771_p4 = scmp.lt.s32.totalorder %s2765_s18, %s2765_s18 }
  0x2f   :  { %v2890_v43 = vsub.f32 %v66_v19, %v180_v30  ;;  %v3761_v44 = vand.u32 4294901760, %v2878_v32  ;;  %v2893_v45 = vpack.c.bf16 %v132_v34, %v129_v33  ;;  %v2895_v46 = vsub.f32 %v49_v23, %v129_v33 }
  0x30   :  { %2332 = vmatpush3.bf16.msra.mxu0 %v2871_v27  ;;  %v344_v47 = vsub.f32 %v2876_v31, %v3763_v41  ;;  %v232_v48 = vsub.f32 %v2858_v15, %v3759_v35  ;;  %v239_v49 = vsub.f32 %v2862_v21, %v3758_v36  ;;  %v183_v50 = vand.u32 4294901760, %v67_v37  ;;  %v42_v41 = vld [vmem:[#allocation2 + $0x8] sm:$0xff]  ;;  %p2772_p5 = por %p2771_p4, %p2770_p3 }
  0x31   :  { %2334 = vmatprep.subr.bf16.mxu0 %v2885_v39  ;;  %v351_v51 = vsub.f32 %v2878_v32, %v3761_v44  ;;  %v186_v52 = vand.u32 4294901760, %v68_v42  ;;  %v3756_v53 = vand.u32 4294901760, %v2867_v25  ;;  %v3754_v54 = vand.u32 4294901760, %v2869_v26 }
  0x32   :  { %v345_v57 = vand.u32 4294901760, %v344_v47  ;;  %v2913_v58 = vsub.f32 %v50_v24, %v132_v34  ;;  %v233_v59 = vand.u32 4294901760, %v232_v48  ;;  %v240_v60 = vand.u32 4294901760, %v239_v49  ;;  %p2773_p6 = pnand %p2772_p5, %p2766_p2 }
  0x33   :  { %v352_v61 = vand.u32 4294901760, %v351_v51  ;;  %v2915_v62 = vpack.c.bf16 %v186_v52, %v183_v50  ;;  %v2917_v63 = vsub.f32 %v67_v37, %v183_v50  ;;  %v358_v0 = vsub.f32 %v2867_v25, %v3756_v53 }
  0x34   :  { %2336 = vmatpush3.bf16.msra.mxu0 %v2893_v45  ;;  %v2359_v1 = vpack.c.bf16 %v240_v60, %v233_v59  ;;  %v365_v2 = vsub.f32 %v2869_v26, %v3754_v54  ;;  %v135_v3 = vand.u32 4294901760, %v51_v55  ;;  %v138_v4 = vand.u32 4294901760, %v52_v56  ;;  %v72_v59 = vld [vmem:[#allocation5 + $0xd8] sm:$0xff] }
  0x35   :  { %v2357_v7 = vpack.c.bf16 %v352_v61, %v345_v57  ;;  %2338 = vmatprep.subr.bf16.mxu0 %v2915_v62  ;;  %v359_v8 = vand.u32 4294901760, %v358_v0  ;;  %v3753_v9 = vand.u32 4294901760, %v2873_v28  ;;  %v3751_v10 = vand.u32 4294901760, %v2883_v38  ;;  %v71_v57 = vld [vmem:[#allocation5 + $0xd0] sm:$0xff]  ;;  %v76_v54 = vld [vmem:[#allocation5 + $0xf8] sm:$0xff] }
  0x36   :  { %v2929_v12 = vsub.f32 %v68_v42, %v186_v52  ;;  %v366_v13 = vand.u32 4294901760, %v365_v2  ;;  %v2931_v16 = vpack.c.bf16 %v138_v4, %v135_v3  ;;  %v2933_v17 = vsub.f32 %v51_v55, %v135_v3 }
  0x37   :  { %2358 = vmatprep.subr.bf16.mxu1 %v2357_v7  ;;  %v246_v18 = vsub.f32 %v2873_v28, %v3753_v9  ;;  %v253_v19 = vsub.f32 %v2883_v38, %v3751_v10  ;;  %v189_v23 = vand.u32 4294901760, %v69_v5  ;;  %v192_v24 = vand.u32 4294901760, %v70_v6  ;;  %v75_v9 = vld [vmem:[#allocation5 + $0xf0] sm:$0xff] }
  0x38   :  { %2360 = vmatpush3.bf16.msra.mxu1 %v2359_v1  ;;  %v2361_v30 = vpack.c.bf16 %v366_v13, %v359_v8  ;;  %2340 = vmatpush3.bf16.msra.mxu0 %v2931_v16  ;;  %v3749_v33 = vand.u32 4294901760, %v2887_v40  ;;  %v3748_v34 = vand.u32 4294901760, %v2890_v43  ;;  %v141_v37 = vand.u32 4294901760, %v53_v11  ;;  %v55_v1 = vld [vmem:[#allocation5 + $0x50] sm:$0xff] }
  0x39   :  { %v2944_v42 = vsub.f32 %v52_v56, %v138_v4  ;;  %v247_v47 = vand.u32 4294901760, %v246_v18  ;;  %v254_v48 = vand.u32 4294901760, %v253_v19  ;;  %v2946_v49 = vpack.c.bf16 %v192_v24, %v189_v23  ;;  %v56_v18 = vld [vmem:[#allocation5 + $0x58] sm:$0xff] }
  0x3a   :  { %2362 = vmatprep.subr.bf16.mxu1 %v2361_v30  ;;  %v2948_v50 = vsub.f32 %v69_v5, %v189_v23  ;;  %v372_v51 = vsub.f32 %v2887_v40, %v3749_v33  ;;  %v379_v52 = vsub.f32 %v2890_v43, %v3748_v34  ;;  %v144_v55 = vand.u32 4294901760, %v54_v29 }
  0x3b   :  { %v2363_v56 = vpack.c.bf16 %v254_v48, %v247_v47  ;;  %2342 = vmatprep.subr.bf16.mxu0 %v2946_v49  ;;  %v2957_v60 = vsub.f32 %v70_v6, %v192_v24  ;;  %v3746_v61 = vand.u32 4294901760, %v2895_v46  ;;  %v3744_v0 = vand.u32 4294901760, %v2913_v58 }
  0x3c   :  { %v373_v2 = vand.u32 4294901760, %v372_v51  ;;  %v380_v3 = vand.u32 4294901760, %v379_v52  ;;  %v2961_v4 = vpack.c.bf16 %v144_v55, %v141_v37  ;;  %v2963_v5 = vsub.f32 %v53_v11, %v141_v37 }
  0x3d   :  { %2364 = vmatpush3.bf16.msra.mxu1 %v2363_v56  ;;  %v260_v7 = vsub.f32 %v2895_v46, %v3746_v61  ;;  %v267_v6 = vsub.f32 %v2913_v58, %v3744_v0  ;;  %v195_v8 = vand.u32 4294901760, %v71_v57  ;;  %v198_v13 = vand.u32 4294901760, %v72_v59  ;;  %v74_v0 = vld [vmem:[#allocation5 + $0xe8] sm:$0xff] }
  0x3e   :  { %v2365_v19 = vpack.c.bf16 %v380_v3, %v373_v2  ;;  %2344 = vmatpush3.bf16.msra.mxu0 %v2961_v4  ;;  %v3745_v23 = vand.u32 4294901760, %v2917_v63  ;;  %v3747_v11 = vand.u32 4294901760, %v2929_v12  ;;  %v147_v24 = vand.u32 4294901760, %v55_v1  ;;  %v73_v3 = vld [vmem:[#allocation5 + $0xe0] sm:$0xff] }
  0x3f   :  { %v2974_v30 = vsub.f32 %v54_v29, %v144_v55  ;;  %v261_v37 = vand.u32 4294901760, %v260_v7  ;;  %v268_v47 = vand.u32 4294901760, %v267_v6  ;;  %v2976_v48 = vpack.c.bf16 %v198_v13, %v195_v8  ;;  %v57_v6 = vld [vmem:[#allocation5 + $0x60] sm:$0xff] }
  0x40   :  { %2366 = vmatprep.subr.bf16.mxu1 %v2365_v19  ;;  %v2978_v51 = vsub.f32 %v71_v57, %v195_v8  ;;  %v386_v52 = vsub.f32 %v2917_v63, %v3745_v23  ;;  %v393_v56 = vsub.f32 %v2929_v12, %v3747_v11  ;;  %v150_v2 = vand.u32 4294901760, %v56_v18  ;;  %v58_v11 = vld [vmem:[#allocation5 + $0x68] sm:$0xff] }
  0x41   :  { %v2367_v29 = vpack.c.bf16 %v268_v47, %v261_v37  ;;  %2346 = vmatprep.subr.bf16.mxu0 %v2976_v48  ;;  %v2987_v55 = vsub.f32 %v72_v59, %v198_v13  ;;  %v3750_v7 = vand.u32 4294901760, %v2933_v17  ;;  %v3752_v57 = vand.u32 4294901760, %v2944_v42 }
  0x42   :  { %v387_v8 = vand.u32 4294901760, %v386_v52  ;;  %v394_v19 = vand.u32 4294901760, %v393_v56  ;;  %v2991_v23 = vpack.c.bf16 %v150_v2, %v147_v24  ;;  %v2993_v61 = vsub.f32 %v55_v1, %v147_v24 }
  0x43   :  { %2368 = vmatpush3.bf16.msra.mxu1 %v2367_v29  ;;  %v274_v37 = vsub.f32 %v2933_v17, %v3750_v7  ;;  %v281_v59 = vsub.f32 %v2944_v42, %v3752_v57  ;;  %v201_v13 = vand.u32 4294901760, %v73_v3  ;;  %v204_v47 = vand.u32 4294901760, %v74_v0 }
  0x44   :  { %3835 = vst [vmem:[#allocation11_spill] sm:$0xff] %v2991_v23  ;;  %v2369_v34 = vpack.c.bf16 %v394_v19, %v387_v8  ;;  %2348 = vmatpush3.bf16.msra.mxu0 %v2991_v23  ;;  %v3755_v52 = vand.u32 4294901760, %v2948_v50  ;;  %v3757_v1 = vand.u32 4294901760, %v2957_v60  ;;  %v153_v24 = vand.u32 4294901760, %v57_v6 }
  0x45   :  { %v3004_v56 = vsub.f32 %v56_v18, %v150_v2  ;;  %v275_v29 = vand.u32 4294901760, %v274_v37  ;;  %v282_v33 = vand.u32 4294901760, %v281_v59  ;;  %v3006_v7 = vpack.c.bf16 %v204_v47, %v201_v13  ;;  %v59_v37 = vld [vmem:[#allocation5 + $0x70] sm:$0xff] }
  0x46   :  { %2370 = vmatprep.subr.bf16.mxu1 %v2369_v34  ;;  %v3008_v10 = vsub.f32 %v73_v3, %v201_v13  ;;  %v400_v8 = vsub.f32 %v2948_v50, %v3755_v52  ;;  %v407_v19 = vsub.f32 %v2957_v60, %v3757_v1  ;;  %v156_v57 = vand.u32 4294901760, %v58_v11  ;;  %v60_v1 = vld [vmem:[#allocation5 + $0x78] sm:$0xff] }
  0x47   :  { %3836 = vst [vmem:[#allocation12_spill] sm:$0xff] %v3006_v7  ;;  %v2371_v18 = vpack.c.bf16 %v282_v33, %v275_v29  ;;  %2350 = vmatprep.subr.bf16.mxu0 %v3006_v7  ;;  %v3017_v2 = vsub.f32 %v74_v0, %v204_v47  ;;  %v3760_v34 = vand.u32 4294901760, %v2963_v5  ;;  %v3762_v3 = vand.u32 4294901760, %v2974_v30 }
  0x48   :  { %v401_v59 = vand.u32 4294901760, %v400_v8  ;;  %v408_v13 = vand.u32 4294901760, %v407_v19  ;;  %v3021_v52 = vpack.c.bf16 %v156_v57, %v153_v24  ;;  %v3023_v53 = vsub.f32 %v57_v6, %v153_v24 }
  0x49   :  { %2372 = vmatpush3.bf16.msra.mxu1 %v2371_v18  ;;  %v288_v33 = vsub.f32 %v2963_v5, %v3760_v34  ;;  %v295_v0 = vsub.f32 %v2974_v30, %v3762_v3  ;;  %v207_v47 = vand.u32 4294901760, %v75_v9  ;;  %v210_v29 = vand.u32 4294901760, %v76_v54 }
  0x4a   :  { %3837 = vst [vmem:[#allocation13_spill] sm:$0xff] %v3021_v52  ;;  %v2373_v36 = vpack.c.bf16 %v408_v13, %v401_v59  ;;  %2352 = vmatpush3.bf16.msra.mxu0 %v3021_v52  ;;  %v3766_v8 = vand.u32 4294901760, %v2978_v51  ;;  %v3767_v6 = vand.u32 4294901760, %v2987_v55  ;;  %v159_v24 = vand.u32 4294901760, %v59_v37 }
  0x4b   :  { %v3034_v19 = vsub.f32 %v58_v11, %v156_v57  ;;  %v289_v18 = vand.u32 4294901760, %v288_v33  ;;  %v296_v35 = vand.u32 4294901760, %v295_v0  ;;  %v3036_v34 = vpack.c.bf16 %v210_v29, %v207_v47 }
  0x4c   :  { %2374 = vmatprep.subr.bf16.mxu1 %v2373_v36  ;;  %v3038_v44 = vsub.f32 %v75_v9, %v207_v47  ;;  %v414_v59 = vsub.f32 %v2978_v51, %v3766_v8  ;;  %v421_v13 = vsub.f32 %v2987_v55, %v3767_v6  ;;  %v162_v3 = vand.u32 4294901760, %v60_v1  ;;  %v41_v9 = vld [vmem:[#allocation2] sm:$0xff] }
  0x4d   :  { %3838 = vst [vmem:[#allocation14_spill] sm:$0xff] %v3036_v34  ;;  %v2375_v52 = vpack.c.bf16 %v296_v35, %v289_v18  ;;  %2354 = vmatprep.subr.bf16.mxu0 %v3036_v34  ;;  %v3047_v11 = vsub.f32 %v76_v54, %v210_v29  ;;  %v3768_v57 = vand.u32 4294901760, %v2993_v61  ;;  %v3769_v36 = vand.u32 4294901760, %v3004_v56 }
  0x4e   :  { %v415_v33 = vand.u32 4294901760, %v414_v59  ;;  %v422_v0 = vand.u32 4294901760, %v421_v13  ;;  %v3051_v47 = vpack.c.bf16 %v162_v3, %v159_v24  ;;  %v3053_v8 = vsub.f32 %v59_v37, %v159_v24 }
  0x4f   :  { %2376 = vmatpush3.bf16.msra.mxu1 %v2375_v52  ;;  %v302_v35 = vsub.f32 %v2993_v61, %v3768_v57  ;;  %v309_v54 = vsub.f32 %v3004_v56, %v3769_v36  ;;  %v3061_v29 = vand.u32 4294901760, %v42_v41  ;;  %v3772_v18 = vand.u32 4294901760, %v3008_v10 }
  0x50   :  { %3839 = vst [vmem:[#allocation15_spill] sm:$0xff] %v3051_v47  ;;  %v2377_v6 = vpack.c.bf16 %v422_v0, %v415_v33  ;;  %2356 = vmatpush3.bf16.msra.mxu0 %v3051_v47  ;;  %v3778_v59 = vand.u32 4294901760, %v3017_v2  ;;  %v2389_v52 = vpack.c.bf16 %v2878_v32, %v2876_v31  ;;  %v3068_v37 = vand.u32 4294901760, %v41_v9 }
  0x51   :  { %3840 = vst [vmem:[#allocation16_spill] sm:$0xff] %v3061_v29  ;;  %v303_v24 = vand.u32 4294901760, %v302_v35  ;;  %v310_v13 = vand.u32 4294901760, %v309_v54  ;;  %v3071_v57 = vsub.f32 %v42_v41, %v3061_v29  ;;  %v428_v36 = vsub.f32 %v3008_v10, %v3772_v18  ;;  %453 = vmatprep.mubr.f32.mxu1 %v3061_v29 }
  0x52   :  { %2378 = vmatprep.subr.bf16.mxu1 %v2377_v6  ;;  %v435_v33 = vsub.f32 %v3017_v2, %v3778_v59  ;;  %2390 = vmatprep.subr.bf16.mxu0 %v2389_v52  ;;  %v3081_v0 = vsub.f32 %v41_v9, %v3068_v37  ;;  %v3777_v35 = vand.u32 4294901760, %v3023_v53  ;;  %v3779_v41 = vand.u32 4294901760, %v3034_v19 }
  0x53   :  { %v3085_v54 = vsub.f32 %v60_v1, %v162_v3  ;;  %v2379_v47 = vpack.c.bf16 %v310_v13, %v303_v24  ;;  %v3780_v18 = vand.u32 4294901760, %v3071_v57  ;;  %v429_v34 = vand.u32 4294901760, %v428_v36 }
  0x54   :  { %v436_v29 = vand.u32 4294901760, %v435_v33  ;;  %v220_v6 = vand.u32 4294901760, %v3081_v0  ;;  %v316_v52 = vsub.f32 %v3023_v53, %v3777_v35  ;;  %v323_v9 = vsub.f32 %v3034_v19, %v3779_v41 }
  0x55   :  { %2380 = vmatpush3.bf16.msra.mxu1 %v2379_v47  ;;  %v215_v1 = vsub.f32 %v3071_v57, %v3780_v18  ;;  %v2391_v3 = vpack.c.bf16 %v2862_v21, %v2858_v15  ;;  %v3785_v36 = vand.u32 4294901760, %v3038_v44  ;;  %v3788_v24 = vand.u32 4294901760, %v3047_v11 }
  0x56   :  { %v2381_v13 = vpack.c.bf16 %v436_v29, %v429_v34  ;;  %v221_v33 = vsub.f32 %v3081_v0, %v220_v6  ;;  %v317_v35 = vand.u32 4294901760, %v316_v52  ;;  %v324_v59 = vand.u32 4294901760, %v323_v9 }
  0x57   :  { %v216_v41 = vand.u32 4294901760, %v215_v1  ;;  %v442_v47 = vsub.f32 %v3038_v44, %v3785_v36  ;;  %v449_v18 = vsub.f32 %v3047_v11, %v3788_v24  ;;  %v3787_v7 = vand.u32 4294901760, %v3053_v8 }
  0x58   :  { %2382 = vmatprep.subr.bf16.mxu1 %v2381_v13  ;;  %v222_v23 = vand.u32 4294901760, %v221_v33  ;;  %v2383_v34 = vpack.c.bf16 %v324_v59, %v317_v35  ;;  %v2393_v29 = vpack.c.bf16 %v2869_v26, %v2867_v25  ;;  %v3786_v52 = vand.u32 4294901760, %v3085_v54 }
  0x59   :  { %217 = vmatprep.mubr.f32.mxu0 %v216_v41  ;;  %v443_v9 = vand.u32 4294901760, %v442_v47  ;;  %v450_v1 = vand.u32 4294901760, %v449_v18  ;;  %v330_v36 = vsub.f32 %v3053_v8, %v3787_v7  ;;  %v2395_v33 = vpack.c.bf16 %v2883_v38, %v2873_v28 }
  0x5a   :  { %223 = vmatmul.mubr.f32.vlgmr.msra.gmra.mrb[0].mxu0 %v222_v23  ;;  %2384 = vmatpush3.bf16.msra.mxu1 %v2383_v34  ;;  %v337_v13 = vsub.f32 %v3085_v54, %v3786_v52  ;;  %v2397_v41 = vpack.c.bf16 %v2890_v43, %v2887_v40  ;;  %v2399_v23 = vpack.c.bf16 %v2913_v58, %v2895_v46  ;;  %v3842_v34 = vand.u32 4294901760, %v2878_v32 }
  0x5b   :  { %2392 = vmatpush3.bf16.msra.mxu0 %v2391_v3  ;;  %v2385_v59 = vpack.c.bf16 %v450_v1, %v443_v9  ;;  %v331_v35 = vand.u32 4294901760, %v330_v36  ;;  %590 = vmatprep.mubr.f32.mxu0 %v3071_v57  ;;  %v2401_v47 = vpack.c.bf16 %v2929_v12, %v2917_v63  ;;  %v3841_v36 = vand.u32 4294901760, %v2876_v31 }
  0x5c   :  { %2394 = vmatprep.subr.bf16.mxu0 %v2393_v29  ;;  %v338_v18 = vand.u32 4294901760, %v337_v13  ;;  %v3843_v1 = vand.u32 4294901760, %v2858_v15  ;;  %v3844_v29 = vand.u32 4294901760, %v2862_v21  ;;  %v3845_v52 = vand.u32 4294901760, %v2867_v25 }
  0x5d   :  { %2386 = vmatprep.subr.bf16.mxu1 %v2385_v59  ;;  %v2453_v9 = vpack.c.bf16 %v3842_v34, %v3841_v36  ;;  %v3846_v59 = vand.u32 4294901760, %v2869_v26  ;;  %v3847_v24 = vand.u32 4294901760, %v2873_v28  ;;  %v3849_v31 = vand.u32 4294901760, %v2887_v40 }
  0x5e   :  { %v2387_v3 = vpack.c.bf16 %v338_v18, %v331_v35  ;;  %v2455_v13 = vpack.c.bf16 %v3844_v29, %v3843_v1  ;;  %v3848_v35 = vand.u32 4294901760, %v2883_v38  ;;  %v3850_v32 = vand.u32 4294901760, %v2890_v43  ;;  %v3864_v29 = vld [vmem:[#allocation16_spill] sm:$0xff] }
  0x5f   :  { %v2457_v7 = vpack.c.bf16 %v3846_v59, %v3845_v52  ;;  %2396 = vmatpush3.bf16.msra.mxu0 %v2395_v33  ;;  %v3851_v15 = vand.u32 4294901760, %v2895_v46  ;;  %v3852_v21 = vand.u32 4294901760, %v2913_v58  ;;  %v3853_v25 = vand.u32 4294901760, %v2917_v63  ;;  %v94_v59 = vld [vmem:[#allocation5 + $0x188] sm:$0xff] }
  0x60   :  { %v2459_v18 = vpack.c.bf16 %v3848_v35, %v3847_v24  ;;  %v2461_v36 = vpack.c.bf16 %v3850_v32, %v3849_v31  ;;  %v3854_v26 = vand.u32 4294901760, %v2929_v12  ;;  %2388 = vmatpush3.bf16.msra.mxu1 %v2387_v3  ;;  %2398 = vmatprep.subr.bf16.mxu0 %v2397_v41  ;;  %v3855_v28 = vand.u32 4294901760, %v2933_v17  ;;  %v77_v35 = vld [vmem:[#allocation5 + $0x100] sm:$0xff]  ;;  %v78_v31 = vld [vmem:[#allocation5 + $0x108] sm:$0xff]  ;;  %v3865_v32 = vld [vmem:[#allocation13_spill] sm:$0xff] }
  0x61   :  { %v3154_v34 = vpack.c.bf16 %v3852_v21, %v3851_v15  ;;  %v3856_v38 = vand.u32 4294901760, %v2944_v42  ;;  %v3857_v43 = vand.u32 4294901760, %v2948_v50  ;;  %v3858_v46 = vand.u32 4294901760, %v2957_v60  ;;  %2422 = vmatprep.subr.bf16.mxu1 %v2856_v14  ;;  %v3866_v15 = vld [vmem:[#allocation14_spill] sm:$0xff] }
  0x62   :  { %v3160_v52 = vpack.c.bf16 %v3854_v26, %v3853_v25  ;;  %v3859_v63 = vand.u32 4294901760, %v2963_v5  ;;  %v3860_v12 = vand.u32 4294901760, %v2974_v30  ;;  %v2403_v33 = vpack.c.bf16 %v2944_v42, %v2933_v17 }
  0x63   :  { %v3166_v40 = vpack.c.bf16 %v3856_v38, %v3855_v28  ;;  %v3172_v58 = vpack.c.bf16 %v3858_v46, %v3857_v43  ;;  %455 = vmatmul.mubr.f32.vlgmr.msra.gmra.mrb[0].mxu1 %v3068_v37  ;;  %2400 = vmatpush3.bf16.msra.mxu0 %v2399_v23  ;;  %v2405_v41 = vpack.c.bf16 %v2957_v60, %v2948_v50  ;;  %v3861_v3 = vand.u32 4294901760, %v3071_v57  ;;  %v3862_v57 = vld [vmem:[#allocation11_spill] sm:$0xff]  ;;  %v3863_v23 = vld [vmem:[#allocation12_spill] sm:$0xff] }
  0x64   :  { %v3178_v24 = vpack.c.bf16 %v3860_v12, %v3859_v63  ;;  %2424 = vmatpush3.bf16.msra.mxu1 %v2860_v20  ;;  %2402 = vmatprep.subr.bf16.mxu0 %v2401_v47  ;;  %v2407_v1 = vpack.c.bf16 %v2974_v30, %v2963_v5  ;;  %v2409_v17 = vpack.c.bf16 %v2987_v55, %v2978_v51  ;;  %v93_v47 = vld [vmem:[#allocation5 + $0x180] sm:$0xff]  ;;  %v1030_v25 = vand.u32 4294901760, %v94_v59  ;;  %v3867_v28 = vld [vmem:[#allocation15_spill] sm:$0xff]  ;;  %v95_v38 = vld [vmem:[#allocation5 + $0x190] sm:$0xff] }
  0x65   :  { %2426 = vmatprep.subr.bf16.mxu1 %v2864_v22  ;;  %697 = vmatprep.mubr.f32.mxu1 %v3861_v3  ;;  %v2411_v42 = vpack.c.bf16 %v3004_v56, %v2993_v61  ;;  %v2413_v50 = vpack.c.bf16 %v3017_v2, %v3008_v10  ;;  %v2415_v60 = vpack.c.bf16 %v3034_v19, %v3023_v53  ;;  %v1027_v21 = vand.u32 4294901760, %v93_v47  ;;  %v79_v46 = vld [vmem:[#allocation5 + $0x110] sm:$0xff]  ;;  %v80_v63 = vld [vmem:[#allocation5 + $0x118] sm:$0xff] }
  0x66   :  { %v2417_v5 = vpack.c.bf16 %v3047_v11, %v3038_v44  ;;  %v2419_v30 = vpack.c.bf16 %v3085_v54, %v3053_v8  ;;  %v979_v26 = vand.u32 4294901760, %v77_v35  ;;  %v3222_v12 = vsub.f32 %v94_v59, %v1030_v25 }
  0x67   :  { %2404 = vmatpush3.bf16.msra.mxu0 %v2403_v33  ;;  %v3220_v43 = vsub.f32 %v93_v47, %v1027_v21 }
  0x68   :  { %2428 = vmatpush3.bf16.msra.mxu1 %v2871_v27  ;;  %2406 = vmatprep.subr.bf16.mxu0 %v2405_v41  ;;  %v1033_v41 = vand.u32 4294901760, %v95_v38  ;;  %v3798_v59 = vand.u32 4294901760, %v3222_v12 }
  0x69   :  { %2430 = vmatprep.subr.bf16.mxu1 %v2885_v39 }
  0x6b   :  { %2408 = vmatpush3.bf16.msra.mxu0 %v2407_v1  ;;  %v3870_v1 = vand.u32 4294901760, %v2993_v61 }
  0x6c   :  { %2432 = vmatpush3.bf16.msra.mxu1 %v2893_v45  ;;  %2410 = vmatprep.subr.bf16.mxu0 %v2409_v17  ;;  %v3871_v17 = vand.u32 4294901760, %v3004_v56  ;;  %v3876_v56 = vand.u32 4294901760, %v3038_v44  ;;  %v81_v44 = vld [vmem:[#allocation5 + $0x120] sm:$0xff] }
  0x6d   :  { %2434 = vmatprep.subr.bf16.mxu1 %v2915_v62 }
  0x6f   :  { %2412 = vmatpush3.bf16.msra.mxu0 %v2411_v42  ;;  %v2475_v42 = vpack.c.bf16 %v3871_v17, %v3870_v1  ;;  %v99_v17 = vld [vmem:[#allocation5 + $0x1b0] sm:$0xff] }
  0x70   :  { %2436 = vmatpush3.bf16.msra.mxu1 %v2931_v16  ;;  %2414 = vmatprep.subr.bf16.mxu0 %v2413_v50  ;;  %v97_v50 = vld [vmem:[#allocation5 + $0x1a0] sm:$0xff] }
  0x71   :  { %2438 = vmatprep.subr.bf16.mxu1 %v2946_v49 }
  0x73   :  { %2416 = vmatpush3.bf16.msra.mxu0 %v2415_v60  ;;  %v98_v60 = vld [vmem:[#allocation5 + $0x1a8] sm:$0xff] }
  0x74   :  { %2440 = vmatpush3.bf16.msra.mxu1 %v2961_v4  ;;  %2418 = vmatprep.subr.bf16.mxu0 %v2417_v5 }
  0x75   :  { %2442 = vmatprep.subr.bf16.mxu1 %v2976_v48 }
  0x77   :  { %2420 = vmatpush3.bf16.msra.mxu0 %v2419_v30  ;;  %v3879_v30 = vand.u32 4294901760, %v3085_v54 }
  0x78   :  { %2444 = vmatpush3.bf16.msra.mxu1 %v3862_v57  ;;  %2454 = vmatprep.subr.bf16.mxu0 %v2453_v9  ;;  %v982_v9 = vand.u32 4294901760, %v78_v31 }
  0x79   :  { %2446 = vmatprep.subr.bf16.mxu1 %v3863_v23 }
  0x7a   :  { %593 = vmatmul.mubr.f32.vlgmr.msra.gmra.mrb[2].mxu0 %v3081_v0  ;;  %v3226_v33 = vsub.f32 %v78_v31, %v982_v9  ;;  %v3872_v0 = vand.u32 4294901760, %v3008_v10  ;;  %v3877_v10 = vand.u32 4294901760, %v3047_v11 }
  0x7b   :  { %2456 = vmatpush3.bf16.msra.mxu0 %v2455_v13  ;;  %867 = vmatprep.mubr.f32.mxu0 %v3864_v29  ;;  %v96_v13 = vld [vmem:[#allocation5 + $0x198] sm:$0xff] }
  0x7c   :  { %2448 = vmatpush3.bf16.msra.mxu1 %v3865_v32  ;;  %2458 = vmatprep.subr.bf16.mxu0 %v2457_v7  ;;  %v3224_v7 = vsub.f32 %v77_v35, %v979_v26  ;;  %v1036_v3 = vand.u32 4294901760, %v96_v13  ;;  %v3258_v5 = vpack.c.bf16 %v3877_v10, %v3876_v56  ;;  %v82_v35 = vld [vmem:[#allocation5 + $0x128] sm:$0xff]  ;;  %v3789_v31 = vand.u32 4294901760, %v3226_v33 }
  0x7d   :  { %2450 = vmatprep.subr.bf16.mxu1 %v3866_v15 }
  0x7e   :  { %v3795_v11 = vand.u32 4294901760, %v3224_v7  ;;  %v3276_v54 = vpack.c.bf16 %v1036_v3, %v1033_v41 }
  0x7f   :  { %2460 = vmatpush3.bf16.msra.mxu0 %v2459_v18  ;;  %v3868_v18 = vand.u32 4294901760, %v2978_v51  ;;  %v985_v51 = vand.u32 4294901760, %v79_v46 }
  0x80   :  { %2452 = vmatpush3.bf16.msra.mxu1 %v3867_v28  ;;  %2462 = vmatprep.subr.bf16.mxu0 %v2461_v36  ;;  %v3869_v36 = vand.u32 4294901760, %v2987_v55  ;;  %v988_v55 = vand.u32 4294901760, %v80_v63  ;;  %3881 = vst [vmem:[#allocation12_spill] sm:$0xff] %v3276_v54 }
  0x81   :  { %2486 = vmatprep.subr.bf16.mxu1 %v2856_v14 }
  0x82   :  { %v2473_v14 = vpack.c.bf16 %v3869_v36, %v3868_v18  ;;  %v1042_v18 = vand.u32 4294901760, %v98_v60  ;;  %v3284_v36 = vpack.c.bf16 %v988_v55, %v985_v51 }
  0x83   :  { %701 = vmatmul.mubr.f32.vlgmr.msra.gmra.mrb[2].mxu1 %v220_v6  ;;  %2464 = vmatpush3.bf16.msra.mxu0 %v3154_v34  ;;  %v3873_v6 = vand.u32 4294901760, %v3017_v2  ;;  %v3878_v2 = vand.u32 4294901760, %v3053_v8  ;;  %v3274_v8 = vpack.c.bf16 %v982_v9, %v979_v26  ;;  %v991_v9 = vand.u32 4294901760, %v81_v44 }
  0x84   :  { %2488 = vmatpush3.bf16.msra.mxu1 %v2860_v20  ;;  %2466 = vmatprep.subr.bf16.mxu0 %v3160_v52  ;;  %v3874_v20 = vand.u32 4294901760, %v3023_v53  ;;  %v3875_v52 = vand.u32 4294901760, %v3034_v19  ;;  %v44_v53 = vld [vmem:[#allocation2 + $0x18] sm:$0xff]  ;;  %v3268_v19 = vpack.c.bf16 %v1030_v25, %v1027_v21  ;;  %v3280_v21 = vsub.f32 %v95_v38, %v1033_v41  ;;  %3882 = vst [vmem:[#allocation16_spill] sm:$0xff] %v3284_v36 }
  0x85   :  { %v3245_v34 = vpack.c.bf16 %v3873_v6, %v3872_v0  ;;  %2490 = vmatprep.subr.bf16.mxu1 %v2864_v22  ;;  %v3264_v47 = vpack.c.bf16 %v3879_v30, %v3878_v2  ;;  %971 = vmatprep.mubr.f32.mxu1 %v3864_v29  ;;  %v3799_v22 = vand.u32 4294901760, %v3220_v43  ;;  %3880 = vst [vmem:[#allocation11_spill] sm:$0xff] %v3274_v8  ;;  %v1039_v29 = vand.u32 4294901760, %v97_v50 }
  0x86   :  { %v3252_v61 = vpack.c.bf16 %v3875_v52, %v3874_v20  ;;  %v3282_v25 = vsub.f32 %v96_v13, %v1036_v3  ;;  %v3286_v1 = vand.u32 4294901760, %v44_v53  ;;  %v3294_v38 = vsub.f32 %v80_v63, %v988_v55  ;;  %v83_v52 = vld [vmem:[#allocation5 + $0x130] sm:$0xff] }
  0x87   :  { %2468 = vmatpush3.bf16.msra.mxu0 %v3166_v40  ;;  %v3289_v40 = vsub.f32 %v79_v46, %v985_v51  ;;  %v1206_v26 = vsub.f32 %v3220_v43, %v3799_v22  ;;  %v1213_v13 = vsub.f32 %v3222_v12, %v3798_v59  ;;  %v1101_v46 = vsub.f32 %v3226_v33, %v3789_v31  ;;  %v101_v31 = vld [vmem:[#allocation5 + $0x1c0] sm:$0xff]  ;;  %v88_v22 = vld [vmem:[#allocation5 + $0x158] sm:$0xff] }
  0x88   :  { %2492 = vmatpush3.bf16.msra.mxu1 %v2871_v27  ;;  %2470 = vmatprep.subr.bf16.mxu0 %v3172_v58  ;;  %3883 = vst [vmem:[#allocation13_spill] sm:$0xff] %v3286_v1  ;;  %v994_v27 = vand.u32 4294901760, %v82_v35  ;;  %v100_v58 = vld [vmem:[#allocation5 + $0x1b8] sm:$0xff]  ;;  %v3306_v41 = vpack.c.bf16 %v1042_v18, %v1039_v29  ;;  %v3308_v3 = vsub.f32 %v97_v50, %v1039_v29  ;;  %v1045_v6 = vand.u32 4294901760, %v99_v17 }
  0x89   :  { %2494 = vmatprep.subr.bf16.mxu1 %v2885_v39  ;;  %v1094_v39 = vsub.f32 %v3224_v7, %v3795_v11  ;;  %v3310_v63 = vsub.f32 %v98_v60, %v1042_v18  ;;  %v3313_v0 = vsub.f32 %v44_v53, %v3286_v1  ;;  %v1048_v51 = vand.u32 4294901760, %v100_v58 }
  0x8a   :  { %3884 = vst [vmem:[#allocation14_spill] sm:$0xff] %v3306_v41  ;;  %v3793_v55 = vand.u32 4294901760, %v3280_v21  ;;  %v3790_v20 = vand.u32 4294901760, %v3282_v25  ;;  %v1207_v50 = vand.u32 4294901760, %v1206_v26  ;;  %v3319_v56 = vpack.c.bf16 %v994_v27, %v991_v9 }
  0x8b   :  { %2472 = vmatpush3.bf16.msra.mxu0 %v3178_v24  ;;  %v84_v24 = vld [vmem:[#allocation5 + $0x138] sm:$0xff]  ;;  %v3321_v60 = vsub.f32 %v81_v44, %v991_v9  ;;  %v3323_v10 = vsub.f32 %v82_v35, %v994_v27  ;;  %v1214_v2 = vand.u32 4294901760, %v1213_v13  ;;  %v3792_v30 = vand.u32 4294901760, %v3289_v40  ;;  %v102_v27 = vld [vmem:[#allocation5 + $0x1c8] sm:$0xff] }
  0x8c   :  { %2496 = vmatpush3.bf16.msra.mxu1 %v2893_v45  ;;  %2474 = vmatprep.subr.bf16.mxu0 %v2473_v14  ;;  %3885 = vst [vmem:[#allocation15_spill] sm:$0xff] %v3319_v56  ;;  %v1095_v45 = vand.u32 4294901760, %v1094_v39  ;;  %v1102_v14 = vand.u32 4294901760, %v1101_v46  ;;  %v997_v53 = vand.u32 4294901760, %v83_v52  ;;  %v1000_v29 = vand.u32 4294901760, %v84_v24 }
  0x8d   :  { %2498 = vmatprep.subr.bf16.mxu1 %v2915_v62  ;;  %v3791_v18 = vand.u32 4294901760, %v3294_v38  ;;  %v3802_v62 = vand.u32 4294901760, %v3313_v0  ;;  %v3330_v44 = vpack.c.bf16 %v1048_v51, %v1045_v6  ;;  %v1220_v35 = vsub.f32 %v3280_v21, %v3793_v55 }
  0x8e   :  { %v3339_v26 = vsub.f32 %v99_v17, %v1045_v6  ;;  %v3341_v9 = vsub.f32 %v100_v58, %v1048_v51  ;;  %v3345_v13 = vpack.c.bf16 %v1214_v2, %v1207_v50  ;;  %v3347_v39 = vpack.c.bf16 %v1102_v14, %v1095_v45 }
  0x8f   :  { %2476 = vmatpush3.bf16.msra.mxu0 %v2475_v42  ;;  %3886 = vst [vmem:[#allocation17_spill] sm:$0xff] %v3330_v44  ;;  %v1227_v42 = vsub.f32 %v3282_v25, %v3790_v20  ;;  %v1108_v46 = vsub.f32 %v3289_v40, %v3792_v30  ;;  %v1051_v20 = vand.u32 4294901760, %v101_v31  ;;  %v1115_v17 = vsub.f32 %v3294_v38, %v3791_v18 }
  0x90   :  { %2500 = vmatpush3.bf16.msra.mxu1 %v2931_v16  ;;  %2478 = vmatprep.subr.bf16.mxu0 %v3245_v34  ;;  %v3794_v16 = vand.u32 4294901760, %v3308_v3  ;;  %v3797_v34 = vand.u32 4294901760, %v3310_v63  ;;  %v3796_v58 = vand.u32 4294901760, %v3321_v60  ;;  %v1077_v6 = vsub.f32 %v3313_v0, %v3802_v62 }
  0x91   :  { %2502 = vmatprep.subr.bf16.mxu1 %v2946_v49  ;;  %v3353_v49 = vpack.c.bf16 %v1000_v29, %v997_v53  ;;  %v1221_v51 = vand.u32 4294901760, %v1220_v35  ;;  %v1228_v50 = vand.u32 4294901760, %v1227_v42  ;;  %v1054_v2 = vand.u32 4294901760, %v102_v27  ;;  %v86_v42 = vld [vmem:[#allocation5 + $0x148] sm:$0xff] }
  0x92   :  { %v3801_v45 = vand.u32 4294901760, %v3323_v10  ;;  %v3366_v14 = vsub.f32 %v83_v52, %v997_v53  ;;  %v3368_v18 = vsub.f32 %v84_v24, %v1000_v29  ;;  %v1234_v30 = vsub.f32 %v3308_v3, %v3794_v16  ;;  %v103_v29 = vld [vmem:[#allocation5 + $0x1d0] sm:$0xff]  ;;  %v104_v16 = vld [vmem:[#allocation5 + $0x1d8] sm:$0xff] }
  0x93   :  { %2480 = vmatpush3.bf16.msra.mxu0 %v3252_v61  ;;  %3887 = vst [vmem:[#allocation18_spill] sm:$0xff] %v3353_v49  ;;  %v85_v61 = vld [vmem:[#allocation5 + $0x140] sm:$0xff]  ;;  %v3376_v35 = vsub.f32 %v101_v31, %v1051_v20  ;;  %v3800_v55 = vand.u32 4294901760, %v3339_v26  ;;  %v1116_v52 = vand.u32 4294901760, %v1115_v17  ;;  %v1122_v53 = vsub.f32 %v3321_v60, %v3796_v58 }
  0x94   :  { %2504 = vmatpush3.bf16.msra.mxu1 %v2961_v4  ;;  %2482 = vmatprep.subr.bf16.mxu0 %v3258_v5  ;;  %v1241_v4 = vsub.f32 %v3310_v63, %v3797_v34  ;;  %v1109_v5 = vand.u32 4294901760, %v1108_v46  ;;  %v1003_v24 = vand.u32 4294901760, %v85_v61  ;;  %v1078_v11 = vand.u32 4294901760, %v1077_v6  ;;  %v87_v6 = vld [vmem:[#allocation5 + $0x150] sm:$0xff] }
  0x95   :  { %2506 = vmatprep.subr.bf16.mxu1 %v2976_v48  ;;  %v3803_v48 = vand.u32 4294901760, %v3341_v9  ;;  %v3386_v31 = vpack.c.bf16 %v1228_v50, %v1221_v51  ;;  %v3388_v46 = vpack.c.bf16 %v1054_v2, %v1051_v20  ;;  %v3394_v17 = vsub.f32 %v102_v27, %v1054_v2 }
  0x96   :  { %v1235_v58 = vand.u32 4294901760, %v1234_v30  ;;  %v1242_v34 = vand.u32 4294901760, %v1241_v4  ;;  %v1006_v59 = vand.u32 4294901760, %v86_v42  ;;  %v1060_v51 = vand.u32 4294901760, %v104_v16 }
  0x97   :  { %2484 = vmatpush3.bf16.msra.mxu0 %v3264_v47  ;;  %3888 = vst [vmem:[#allocation19_spill] sm:$0xff] %v3388_v46  ;;  %v1129_v47 = vsub.f32 %v3323_v10, %v3801_v45  ;;  %v1248_v20 = vsub.f32 %v3339_v26, %v3800_v55  ;;  %v1255_v50 = vsub.f32 %v3341_v9, %v3803_v48  ;;  %v1123_v27 = vand.u32 4294901760, %v1122_v53  ;;  %v105_v48 = vld [vmem:[#allocation5 + $0x1e0] sm:$0xff]  ;;  %v106_v53 = vld [vmem:[#allocation5 + $0x1e8] sm:$0xff] }
  0x98   :  { %2508 = vmatpush3.bf16.msra.mxu1 %v3862_v57  ;;  %2518 = vmatprep.subr.bf16.mxu0 %v3268_v19  ;;  %v1057_v57 = vand.u32 4294901760, %v103_v29  ;;  %v3406_v30 = vsub.f32 %v85_v61, %v1003_v24  ;;  %v1009_v55 = vand.u32 4294901760, %v87_v6  ;;  %v1012_v45 = vand.u32 4294901760, %v88_v22 }
  0x99   :  { %2510 = vmatprep.subr.bf16.mxu1 %v3863_v23  ;;  %v3404_v23 = vpack.c.bf16 %v1116_v52, %v1109_v5  ;;  %v1130_v4 = vand.u32 4294901760, %v1129_v47  ;;  %v3808_v62 = vand.u32 4294901760, %v3368_v18  ;;  %v3413_v5 = vpack.c.bf16 %v1242_v34, %v1235_v58 }
  0x9a   :  { %869 = vmatmul.mubr.f32.vlgmr.msra.gmra.mrb[4].mxu0 %v3068_v37  ;;  %v3415_v61 = vpack.c.bf16 %v1006_v59, %v1003_v24  ;;  %v3417_v52 = vsub.f32 %v86_v42, %v1006_v59  ;;  %v1249_v2 = vand.u32 4294901760, %v1248_v20  ;;  %v1256_v47 = vand.u32 4294901760, %v1255_v50  ;;  %v3450_v50 = vld [vmem:[#allocation5 + $0x168] sm:$0xff] }
  0x9b   :  { %2520 = vmatpush3.bf16.msra.mxu0 %v3274_v8  ;;  %1079 = vmatprep.mubr.f32.mxu0 %v1078_v11  ;;  %v3810_v11 = vand.u32 4294901760, %v3376_v35  ;;  %v3423_v8 = vld [vmem:[#allocation5 + $0x160] sm:$0xff]  ;;  %v3428_v34 = vsub.f32 %v104_v16, %v1060_v51  ;;  %v3892_v59 = vand.u32 4294901760, %v3366_v14  ;;  %v1063_v42 = vand.u32 4294901760, %v105_v48 }
  0x9c   :  { %2512 = vmatpush3.bf16.msra.mxu1 %v3865_v32  ;;  %2522 = vmatprep.subr.bf16.mxu0 %v3276_v54  ;;  %v3420_v32 = vpack.c.bf16 %v1060_v51, %v1057_v57  ;;  %v3809_v54 = vand.u32 4294901760, %v3394_v17  ;;  %v3435_v24 = vpack.c.bf16 %v1130_v4, %v1123_v27  ;;  %v3437_v20 = vpack.c.bf16 %v1012_v45, %v1009_v55 }
  0x9d   :  { %2514 = vmatprep.subr.bf16.mxu1 %v3866_v15  ;;  %v3426_v15 = vsub.f32 %v103_v29, %v1057_v57  ;;  %3891 = vst [vmem:[#allocation22_spill] sm:$0xff] %v3428_v34  ;;  %v1136_v58 = vsub.f32 %v3366_v14, %v3892_v59  ;;  %v1143_v29 = vsub.f32 %v3368_v18, %v3808_v62  ;;  %v1066_v57 = vand.u32 4294901760, %v106_v53 }
  0x9e   :  { %3889 = vst [vmem:[#allocation20_spill] sm:$0xff] %v3420_v32  ;;  %v3443_v16 = vsub.f32 %v87_v6, %v1009_v55  ;;  %v3445_v51 = vsub.f32 %v88_v22, %v1012_v45  ;;  %v3811_v27 = vand.u32 4294901760, %v3423_v8  ;;  %v2561_v4 = vpack.c.bf16 %v1256_v47, %v1249_v2  ;;  %v3460_v22 = vld [vmem:[#allocation5 + $0x1f8] sm:$0xff]  ;;  %v3483_v2 = vld [vmem:[#allocation5 + $0x170] sm:$0xff] }
  0x9f   :  { %2524 = vmatpush3.bf16.msra.mxu0 %v3284_v36  ;;  %3890 = vst [vmem:[#allocation21_spill] sm:$0xff] %v3426_v15  ;;  %v1269_v59 = vsub.f32 %v3394_v17, %v3809_v54  ;;  %v1137_v45 = vand.u32 4294901760, %v1136_v58  ;;  %v3464_v6 = vsub.f32 %v105_v48, %v1063_v42  ;;  %v43_v54 = vld [vmem:[#allocation2 + $0x10] sm:$0xff]  ;;  %v3470_v55 = vpack.c.bf16 %v1066_v57, %v1063_v42  ;;  %v3485_v42 = vld [vmem:[#allocation5 + $0x178] sm:$0xff] }
  0xa0   :  { %2516 = vmatpush3.bf16.msra.mxu1 %v3867_v28  ;;  %2526 = vmatprep.subr.bf16.mxu0 %v3306_v41  ;;  %v1262_v28 = vsub.f32 %v3376_v35, %v3810_v11  ;;  %v1144_v11 = vand.u32 4294901760, %v1143_v29  ;;  %v3472_v62 = vsub.f32 %v106_v53, %v1066_v57  ;;  %v3479_v58 = vsub.f32 %v3423_v8, %v3811_v27 }
  0xa1   :  { %2550 = vmatprep.subr.bf16.mxu1 %v3345_v13  ;;  %v3458_v13 = vld [vmem:[#allocation5 + $0x1f0] sm:$0xff]  ;;  %v1270_v53 = vand.u32 4294901760, %v1269_v59  ;;  %v3893_v29 = vand.u32 4294901760, %v3406_v30  ;;  %v3894_v57 = vand.u32 4294901760, %v3417_v52  ;;  %v3494_v27 = vand.u32 4294901760, %v43_v54 }
  0xa2   :  { %v1263_v48 = vand.u32 4294901760, %v1262_v28  ;;  %v1069_v47 = vand.u32 4294901760, %v3458_v13  ;;  %v3896_v41 = vand.u32 4294901760, %v3428_v34 }
  0xa3   :  { %973 = vmatmul.mubr.f32.vlgmr.msra.gmra.mrb[4].mxu1 %v3068_v37  ;;  %2528 = vmatpush3.bf16.msra.mxu0 %v3319_v56  ;;  %v1018_v37 = vand.u32 4294901760, %v3450_v50  ;;  %v1157_v28 = vsub.f32 %v3417_v52, %v3894_v57  ;;  %v2563_v57 = vpack.c.bf16 %v1144_v11, %v1137_v45 }
  0xa4   :  { %2552 = vmatpush3.bf16.msra.mxu1 %v3347_v39  ;;  %2530 = vmatprep.subr.bf16.mxu0 %v3330_v44  ;;  %v1072_v39 = vand.u32 4294901760, %v3460_v22  ;;  %v3895_v44 = vand.u32 4294901760, %v3426_v15  ;;  %v1283_v59 = vsub.f32 %v3428_v34, %v3896_v41  ;;  %v3514_v41 = vsub.f32 %v3458_v13, %v1069_v47 }
  0xa5   :  { %2554 = vmatprep.subr.bf16.mxu1 %v3386_v31  ;;  %1315 = vmatprep.mubr.f32.mxu1 %v3286_v1  ;;  %v1150_v31 = vsub.f32 %v3406_v30, %v3893_v29  ;;  %v3508_v36 = vsub.f32 %v3450_v50, %v1018_v37  ;;  %v3832_v29 = vand.u32 4294901760, %v3472_v62  ;;  %v2565_v11 = vpack.c.bf16 %v1270_v53, %v1263_v48 }
  0xa6   :  { %v1276_v56 = vsub.f32 %v3426_v15, %v3895_v44  ;;  %v1024_v44 = vand.u32 4294901760, %v3485_v42  ;;  %v3517_v1 = vsub.f32 %v3460_v22, %v1072_v39  ;;  %v1158_v50 = vand.u32 4294901760, %v1157_v28 }
  0xa7   :  { %2532 = vmatpush3.bf16.msra.mxu0 %v3353_v49  ;;  %v1021_v49 = vand.u32 4294901760, %v3483_v2  ;;  %v1151_v45 = vand.u32 4294901760, %v1150_v31  ;;  %v3897_v13 = vand.u32 4294901760, %v3443_v16  ;;  %v3898_v22 = vand.u32 4294901760, %v3445_v51 }
  0xa8   :  { %2556 = vmatpush3.bf16.msra.mxu1 %v3404_v23  ;;  %2534 = vmatprep.subr.bf16.mxu0 %v3388_v46  ;;  %v3522_v46 = vsub.f32 %v43_v54, %v3494_v27  ;;  %v1277_v34 = vand.u32 4294901760, %v1276_v56  ;;  %v3537_v54 = vsub.f32 %v3485_v42, %v1024_v44  ;;  %v3899_v31 = vand.u32 4294901760, %v3464_v6 }
  0xa9   :  { %2558 = vmatprep.subr.bf16.mxu1 %v3413_v5  ;;  %v1284_v5 = vand.u32 4294901760, %v1283_v59  ;;  %v1164_v15 = vsub.f32 %v3443_v16, %v3897_v13  ;;  %v1171_v23 = vsub.f32 %v3445_v51, %v3898_v22  ;;  %v3534_v48 = vsub.f32 %v3483_v2, %v1021_v49 }
  0xaa   :  { %v1290_v28 = vsub.f32 %v3464_v6, %v3899_v31  ;;  %v1303_v59 = vand.u32 4294901760, %v3514_v41  ;;  %v3900_v42 = vand.u32 4294901760, %v3423_v8  ;;  %v3553_v22 = vpack.c.bf16 %v1072_v39, %v1069_v47 }
  0xab   :  { %2536 = vmatpush3.bf16.msra.mxu0 %v3415_v61  ;;  %v2567_v53 = vpack.c.bf16 %v1158_v50, %v1151_v45  ;;  %v2569_v31 = vpack.c.bf16 %v1284_v5, %v1277_v34  ;;  %v1165_v56 = vand.u32 4294901760, %v1164_v15  ;;  %v3902_v8 = vand.u32 4294901760, %v3508_v36 }
  0xac   :  { %2560 = vmatpush3.bf16.msra.mxu1 %v3435_v24  ;;  %2538 = vmatprep.subr.bf16.mxu0 %v3420_v32  ;;  %v1297_v24 = vsub.f32 %v3472_v62, %v3832_v29  ;;  %v3551_v13 = vpack.c.bf16 %v1018_v37, %v3900_v42  ;;  %v1172_v32 = vand.u32 4294901760, %v1171_v23  ;;  %v3901_v29 = vand.u32 4294901760, %v3479_v58 }
  0xad   :  { %2562 = vmatprep.subr.bf16.mxu1 %v2561_v4  ;;  %v1082_v4 = vand.u32 4294901760, %v3522_v46  ;;  %v1185_v47 = vsub.f32 %v3508_v36, %v3902_v8  ;;  %v3833_v37 = vand.u32 4294901760, %v3534_v48  ;;  %v3834_v39 = vand.u32 4294901760, %v3537_v54 }
  0xae   :  { %v1178_v2 = vsub.f32 %v3479_v58, %v3901_v29  ;;  %v1291_v45 = vand.u32 4294901760, %v1290_v28  ;;  %v1298_v34 = vand.u32 4294901760, %v1297_v24  ;;  %v1304_v15 = vsub.f32 %v3514_v41, %v1303_v59 }
  0xaf   :  { %2540 = vmatpush3.bf16.msra.mxu0 %v3437_v20  ;;  %v1083_v29 = vsub.f32 %v3522_v46, %v1082_v4  ;;  %v3576_v50 = vpack.c.bf16 %v1024_v44, %v1021_v49  ;;  %v2571_v5 = vpack.c.bf16 %v1172_v32, %v1165_v56  ;;  %v1186_v24 = vand.u32 4294901760, %v1185_v47 }
  0xb0   :  { %2564 = vmatpush3.bf16.msra.mxu1 %v2563_v57  ;;  %2542 = vmatprep.subr.bf16.mxu0 %v3470_v55  ;;  %v3903_v57 = vand.u32 4294901760, %v3517_v1  ;;  %v1179_v28 = vand.u32 4294901760, %v1178_v2  ;;  %v1192_v42 = vsub.f32 %v3534_v48, %v3833_v37  ;;  %v1199_v8 = vsub.f32 %v3537_v54, %v3834_v39 }
  0xb1   :  { %2566 = vmatprep.subr.bf16.mxu1 %v2565_v11  ;;  %v2581_v11 = vpack.c.bf16 %v3222_v12, %v3220_v43  ;;  %v2573_v49 = vpack.c.bf16 %v1298_v34, %v1291_v45  ;;  %v1305_v44 = vand.u32 4294901760, %v1304_v15  ;;  %v1084_v56 = vand.u32 4294901760, %v1083_v29  ;;  %v3904_v29 = vld [vmem:[#allocation11_spill] sm:$0xff] }
  0xb2   :  { %v1311_v23 = vsub.f32 %v3517_v1, %v3903_v57  ;;  %v2575_v2 = vpack.c.bf16 %v1186_v24, %v1179_v28  ;;  %v2585_v47 = vpack.c.bf16 %v3282_v25, %v3280_v21  ;;  %v1193_v57 = vand.u32 4294901760, %v1192_v42  ;;  %v3907_v24 = vld [vmem:[#allocation16_spill] sm:$0xff]  ;;  %v3908_v42 = vld [vmem:[#allocation21_spill] sm:$0xff] }
  0xb3   :  { %2544 = vmatpush3.bf16.msra.mxu0 %v3551_v13  ;;  %v1200_v37 = vand.u32 4294901760, %v1199_v8  ;;  %v2589_v34 = vpack.c.bf16 %v3310_v63, %v3308_v3  ;;  %v2591_v15 = vpack.c.bf16 %v3323_v10, %v3321_v60  ;;  %v2599_v28 = vpack.c.bf16 %v3417_v52, %v3406_v30  ;;  %v3909_v8 = vld [vmem:[#allocation22_spill] sm:$0xff] }
  0xb4   :  { %2568 = vmatpush3.bf16.msra.mxu1 %v2567_v53  ;;  %2546 = vmatprep.subr.bf16.mxu0 %v3553_v22  ;;  %v1312_v32 = vand.u32 4294901760, %v1311_v23  ;;  %v2583_v53 = vpack.c.bf16 %v3226_v33, %v3224_v7  ;;  %v2593_v23 = vpack.c.bf16 %v3341_v9, %v3339_v26 }
  0xb5   :  { %2570 = vmatprep.subr.bf16.mxu1 %v2569_v31  ;;  %v2587_v31 = vpack.c.bf16 %v3294_v38, %v3289_v40  ;;  %v2579_v45 = vpack.c.bf16 %v1200_v37, %v1193_v57  ;;  %v2595_v37 = vpack.c.bf16 %v3368_v18, %v3366_v14  ;;  %v2609_v57 = vpack.c.bf16 %v3517_v1, %v3514_v41 }
  0xb6   :  { %v2577_v39 = vpack.c.bf16 %v1312_v32, %v1305_v44  ;;  %v3910_v44 = vld [vmem:[#allocation14_spill] sm:$0xff]  ;;  %v2603_v32 = vpack.c.bf16 %v3445_v51, %v3443_v16 }
  0xb7   :  { %2548 = vmatpush3.bf16.msra.mxu0 %v3576_v50 }
  0xb8   :  { %2572 = vmatpush3.bf16.msra.mxu1 %v2571_v5  ;;  %2582 = vmatprep.subr.bf16.mxu0 %v2581_v11  ;;  %v3905_v5 = vld [vmem:[#allocation12_spill] sm:$0xff]  ;;  %v3906_v11 = vand.u32 4294901760, %v3313_v0 }
  0xb9   :  { %2574 = vmatprep.subr.bf16.mxu1 %v2573_v49  ;;  %v2601_v49 = vpack.c.bf16 %v3909_v8, %v3908_v42 }
  0xba   :  { %1085 = vmatmul.mubr.f32.vlgmr.msra.gmra.mrb[6].mxu0 %v1084_v56  ;;  %v3911_v56 = vld [vmem:[#allocation15_spill] sm:$0xff] }
  0xbb   :  { %2584 = vmatpush3.bf16.msra.mxu0 %v2583_v53  ;;  %1452 = vmatprep.mubr.f32.mxu0 %v3313_v0  ;;  %v2605_v0 = vpack.c.bf16 %v3472_v62, %v3464_v6  ;;  %v3912_v53 = vld [vmem:[#allocation17_spill] sm:$0xff] }
  0xbc   :  { %2576 = vmatpush3.bf16.msra.mxu1 %v2575_v2  ;;  %2586 = vmatprep.subr.bf16.mxu0 %v2585_v47  ;;  %v2607_v2 = vpack.c.bf16 %v3508_v36, %v3479_v58  ;;  %v3913_v47 = vld [vmem:[#allocation18_spill] sm:$0xff] }
  0xbd   :  { %2578 = vmatprep.subr.bf16.mxu1 %v2577_v39  ;;  %v2597_v39 = vpack.c.bf16 %v3394_v17, %v3376_v35 }
  0xbf   :  { %2588 = vmatpush3.bf16.msra.mxu0 %v2587_v31  ;;  %v3914_v31 = vld [vmem:[#allocation19_spill] sm:$0xff] }
  0xc0   :  { %2580 = vmatpush3.bf16.msra.mxu1 %v2579_v45  ;;  %2590 = vmatprep.subr.bf16.mxu0 %v2589_v34  ;;  %v2611_v45 = vpack.c.bf16 %v3537_v54, %v3534_v48  ;;  %v3915_v34 = vand.u32 4294901760, %v3220_v43  ;;  %v3922_v43 = vand.u32 4294901760, %v3289_v40  ;;  %v3928_v40 = vand.u32 4294901760, %v3323_v10 }
  0xc1   :  { %2614 = vmatprep.subr.bf16.mxu1 %v3268_v19  ;;  %v3933_v10 = vand.u32 4294901760, %v3376_v35  ;;  %v3938_v35 = vand.u32 4294901760, %v3909_v8  ;;  %v3944_v8 = vand.u32 4294901760, %v3508_v36 }
  0xc3   :  { %1317 = vmatmul.mubr.f32.vlgmr.msra.gmra.mrb[6].mxu1 %v3494_v27  ;;  %2592 = vmatpush3.bf16.msra.mxu0 %v2591_v15  ;;  %v3916_v15 = vand.u32 4294901760, %v3222_v12  ;;  %v3923_v12 = vand.u32 4294901760, %v3294_v38  ;;  %v3929_v38 = vand.u32 4294901760, %v3339_v26  ;;  %v3934_v26 = vand.u32 4294901760, %v3394_v17 }
  0xc4   :  { %2616 = vmatpush3.bf16.msra.mxu1 %v3904_v29  ;;  %2594 = vmatprep.subr.bf16.mxu0 %v2593_v23  ;;  %v3939_v17 = vand.u32 4294901760, %v3443_v16  ;;  %v3945_v16 = vand.u32 4294901760, %v3517_v1 }
  0xc5   :  { %2618 = vmatprep.subr.bf16.mxu1 %v3905_v5  ;;  %1559 = vmatprep.mubr.f32.mxu1 %v3906_v11  ;;  %v2645_v23 = vpack.c.bf16 %v3916_v15, %v3915_v34  ;;  %v3919_v11 = vand.u32 4294901760, %v3226_v33  ;;  %v3924_v33 = vld [vmem:[#allocation13_spill] sm:$0xff]  ;;  %v3930_v34 = vand.u32 4294901760, %v3341_v9  ;;  %v2661_v9 = vpack.c.bf16 %v3934_v26, %v3933_v10 }
  0xc7   :  { %2596 = vmatpush3.bf16.msra.mxu0 %v2595_v37  ;;  %v3917_v37 = vld [vmem:[#allocation20_spill] sm:$0xff]  ;;  %v2657_v15 = vpack.c.bf16 %v3930_v34, %v3929_v38 }
  0xc8   :  { %2620 = vmatpush3.bf16.msra.mxu1 %v3907_v24  ;;  %2598 = vmatprep.subr.bf16.mxu0 %v2597_v39  ;;  %v3918_v39 = vand.u32 4294901760, %v3224_v7  ;;  %v2651_v7 = vpack.c.bf16 %v3923_v12, %v3922_v43 }
  0xc9   :  { %2622 = vmatprep.subr.bf16.mxu1 %v3910_v44 }
  0xcb   :  { %2600 = vmatpush3.bf16.msra.mxu0 %v2599_v28  ;;  %v2647_v28 = vpack.c.bf16 %v3919_v11, %v3918_v39 }
  0xcc   :  { %2624 = vmatpush3.bf16.msra.mxu1 %v3911_v56  ;;  %2602 = vmatprep.subr.bf16.mxu0 %v2601_v49  ;;  %v3920_v49 = vand.u32 4294901760, %v3280_v21  ;;  %v3925_v21 = vand.u32 4294901760, %v3308_v3  ;;  %v3931_v3 = vand.u32 4294901760, %v3366_v14  ;;  %v3936_v14 = vand.u32 4294901760, %v3417_v52 }
  0xcd   :  { %2626 = vmatprep.subr.bf16.mxu1 %v3912_v53  ;;  %v3942_v52 = vand.u32 4294901760, %v3472_v62  ;;  %v3946_v62 = vand.u32 4294901760, %v3534_v48 }
  0xcf   :  { %2604 = vmatpush3.bf16.msra.mxu0 %v2603_v32  ;;  %v3921_v32 = vand.u32 4294901760, %v3282_v25  ;;  %v3926_v25 = vand.u32 4294901760, %v3310_v63  ;;  %v3932_v63 = vand.u32 4294901760, %v3368_v18  ;;  %v3937_v18 = vand.u32 4294901760, %v3908_v42 }
  0xd0   :  { %2628 = vmatpush3.bf16.msra.mxu1 %v3913_v47  ;;  %2606 = vmatprep.subr.bf16.mxu0 %v2605_v0  ;;  %v3943_v42 = vand.u32 4294901760, %v3479_v58  ;;  %v1904_v58 = vld [vmem:[%s3742_s2] ss:$0 sm:$0xff]  ;;  %s2797_s2 = smov 1  }
  0xd1   :  { %2630 = vmatprep.subr.bf16.mxu1 %v3914_v31  ;;  %v2649_v0 = vpack.c.bf16 %v3921_v32, %v3920_v49 }
  0xd3   :  { %2608 = vmatpush3.bf16.msra.mxu0 %v2607_v2  ;;  %v2653_v2 = vpack.c.bf16 %v3926_v25, %v3925_v21 }
  0xd4   :  { %2632 = vmatpush3.bf16.msra.mxu1 %v3415_v61  ;;  %2610 = vmatprep.subr.bf16.mxu0 %v2609_v57  ;;  %v3927_v57 = vand.u32 4294901760, %v3321_v60  ;;  %v2659_v60 = vpack.c.bf16 %v3932_v63, %v3931_v3 }
  0xd5   :  { %2634 = vmatprep.subr.bf16.mxu1 %v3917_v37 }
  0xd7   :  { %2612 = vmatpush3.bf16.msra.mxu0 %v2611_v45  ;;  %v2655_v45 = vpack.c.bf16 %v3928_v40, %v3927_v57 }
  0xd8   :  { %2636 = vmatpush3.bf16.msra.mxu1 %v3437_v20  ;;  %2646 = vmatprep.subr.bf16.mxu0 %v2645_v23 }
  0xd9   :  { %2638 = vmatprep.subr.bf16.mxu1 %v3470_v55 }
  0xda   :  { %1455 = vmatmul.mubr.f32.vlgmr.msra.gmra.mrb[8].mxu0 %v3522_v46 }
  0xdb   :  { %2648 = vmatpush3.bf16.msra.mxu0 %v2647_v28  ;;  %1729 = vmatprep.mubr.f32.mxu0 %v3924_v33 }
  0xdc   :  { %2640 = vmatpush3.bf16.msra.mxu1 %v3551_v13  ;;  %2650 = vmatprep.subr.bf16.mxu0 %v2649_v0 }
  0xdd   :  { %2642 = vmatprep.subr.bf16.mxu1 %v3553_v22 }
  0xdf   :  { %2652 = vmatpush3.bf16.msra.mxu0 %v2651_v7 }
  0xe0   :  { %2644 = vmatpush3.bf16.msra.mxu1 %v3576_v50  ;;  %2654 = vmatprep.subr.bf16.mxu0 %v2653_v2 }
  0xe1   :  { %2678 = vmatprep.subr.bf16.mxu1 %v3268_v19  ;;  %v3935_v19 = vand.u32 4294901760, %v3406_v30  ;;  %v3941_v30 = vand.u32 4294901760, %v3464_v6  ;;  %v3947_v6 = vand.u32 4294901760, %v3537_v54 }
  0xe3   :  { %1563 = vmatmul.mubr.f32.vlgmr.msra.gmra.mrb[8].mxu1 %v1082_v4  ;;  %2656 = vmatpush3.bf16.msra.mxu0 %v2655_v45  ;;  %v2663_v46 = vpack.c.bf16 %v3936_v14, %v3935_v19  ;;  %v2665_v4 = vpack.c.bf16 %v3938_v35, %v3937_v18 }
  0xe4   :  { %2680 = vmatpush3.bf16.msra.mxu1 %v3904_v29  ;;  %2658 = vmatprep.subr.bf16.mxu0 %v2657_v15  ;;  %v3940_v29 = vand.u32 4294901760, %v3445_v51  ;;  %v2673_v51 = vpack.c.bf16 %v3945_v16, %v1303_v59 }
  0xe5   :  { %2682 = vmatprep.subr.bf16.mxu1 %v3905_v5  ;;  %1833 = vmatprep.mubr.f32.mxu1 %v3924_v33 }
  0xe6   :  { %v2667_v5 = vpack.c.bf16 %v3940_v29, %v3939_v17 }
  0xe7   :  { %2660 = vmatpush3.bf16.msra.mxu0 %v2659_v60 }
  0xe8   :  { %2684 = vmatpush3.bf16.msra.mxu1 %v3907_v24  ;;  %2662 = vmatprep.subr.bf16.mxu0 %v2661_v9  ;;  %v2669_v24 = vpack.c.bf16 %v3942_v52, %v3941_v30 }
  0xe9   :  { %2686 = vmatprep.subr.bf16.mxu1 %v3910_v44  ;;  %v2671_v44 = vpack.c.bf16 %v3944_v8, %v3943_v42 }
  0xeb   :  { %2664 = vmatpush3.bf16.msra.mxu0 %v2663_v46 }
  0xec   :  { %2688 = vmatpush3.bf16.msra.mxu1 %v3911_v56  ;;  %2666 = vmatprep.subr.bf16.mxu0 %v2665_v4  ;;  %v2675_v56 = vpack.c.bf16 %v3947_v6, %v3946_v62  ;;  %v1840_v4 = vlaneseq }
  0xed   :  { %2690 = vmatprep.subr.bf16.mxu1 %v3912_v53 }
  0xee   :  { %v1841_v17 = vand.u32 127, %v1840_v4 }
  0xef   :  { %2668 = vmatpush3.bf16.msra.mxu0 %v2667_v5 }
  0xf0   :  { %2692 = vmatpush3.bf16.msra.mxu1 %v3913_v47  ;;  %2670 = vmatprep.subr.bf16.mxu0 %v2669_v24  ;;  %v1842_v29 = vand.u32 7, %v1841_v17 }
  0xf1   :  { %2694 = vmatprep.subr.bf16.mxu1 %v3914_v31 }
  0xf2   :  { %vm1843_vm0 = vcmp.ge.s32.totalorder %v1842_v29, 1  ;;  %vm1861_vm1 = vcmp.lt.s32.totalorder %v1842_v29, 7  ;;  %v1865_v42 = vadd.s32 1, %v1842_v29  ;;  %vm1851_vm3 = vcmp.ge.s32.totalorder %v1842_v29, 2 }
  0xf3   :  { %2672 = vmatpush3.bf16.msra.mxu0 %v2671_v44  ;;  %vm1856_vm5 = vcmp.ge.s32.totalorder %v1842_v29, 4 }
  0xf4   :  { %2696 = vmatpush3.bf16.msra.mxu1 %v3415_v61  ;;  %2674 = vmatprep.subr.bf16.mxu0 %v2673_v51  ;;  %vm1866_vm2 = vcmp.lt.s32.totalorder %v1865_v42, 8 }
  0xf5   :  { %2698 = vmatprep.subr.bf16.mxu1 %v3917_v37 }
  0xf7   :  { %2676 = vmatpush3.bf16.msra.mxu0 %v2675_v56  ;;  %v1871_v56 = vadd.s32 2, %v1842_v29 }
  0xf8   :  { %2700 = vmatpush3.bf16.msra.mxu1 %v3437_v20 }
  0xf9   :  { %2702 = vmatprep.subr.bf16.mxu1 %v3470_v55  ;;  %vm1872_vm4 = vcmp.lt.s32.totalorder %v1871_v56, 8 }
  0xfa   :  { %1731 = vmatmul.mubr.f32.vlgmr.msra.gmra.mrb[10].mxu0 %v3494_v27 }
  0xfc   :  { %2704 = vmatpush3.bf16.msra.mxu1 %v3551_v13 }
  0xfd   :  { %2706 = vmatprep.subr.bf16.mxu1 %v3553_v22 }
 0x100   :  { %2708 = vmatpush3.bf16.msra.mxu1 %v3576_v50 }
 0x103   :  { %1835 = vmatmul.mubr.f32.vlgmr.msra.gmra.mrb[10].mxu1 %v3494_v27 }
 0x12d   :  { %v1937_v36 = vpop.f32.mrb[0].mxu0 }
 0x12e   :  { %v1938_v1 = vpop.f32.mrb[1].mxu0 }
 0x12f   :  { %v1939_v61 = vadd.f32 %v1938_v1, %v1937_v36 }
 0x131   :  { %v225_v20 = vadd.f32 %v1939_v61, %v1904_v58 }
 0x136   :  { %v1972_v41 = vpop.f32.mrb[0].mxu1 }
 0x137   :  { %v1973_v55 = vpop.f32.mrb[1].mxu1 }
 0x138   :  { %v1974_v48 = vadd.f32 %v1973_v55, %v1972_v41  ;;  %v1877_v55 = vadd.s32 4, %v1842_v29 }
 0x13a   :  { %v457_v54 = vadd.f32 %v1974_v48, %v225_v20  ;;  %vm1878_vm6 = vcmp.lt.s32.totalorder %v1877_v55, 8 }
 0x14d   :  { %v2007_v59 = vpop.f32.mrb[2].mxu0 }
 0x14e   :  { %v2008_v13 = vpop.f32.mrb[3].mxu0 }
 0x14f   :  { %v2009_v53 = vadd.f32 %v2008_v13, %v2007_v59 }
 0x151   :  { %v595_v22 = vadd.f32 %v2009_v53, %v457_v54 }
 0x156   :  { %v2042_v47 = vpop.f32.mrb[2].mxu1 }
 0x157   :  { %v2043_v50 = vpop.f32.mrb[3].mxu1 }
 0x158   :  { %v2044_v31 = vadd.f32 %v2043_v50, %v2042_v47  ;;  %v2804_v47 = vmov 0.0  }
 0x15a   :  { %v703_v27 = vadd.f32 %v2044_v31, %v595_v22 }
 0x16d   :  { %v2077_v23 = vpop.f32.mrb[4].mxu0 }
 0x16e   :  { %v2078_v37 = vpop.f32.mrb[5].mxu0 }
 0x16f   :  { %v2079_v39 = vadd.f32 %v2078_v37, %v2077_v23 }
 0x171   :  { %v871_v11 = vadd.f32 %v2079_v39, %v703_v27 }
 0x176   :  { %v2112_v28 = vpop.f32.mrb[4].mxu1 }
 0x177   :  { %v2113_v49 = vpop.f32.mrb[5].mxu1 }
 0x178   :  { %v2114_v32 = vadd.f32 %v2113_v49, %v2112_v28 }
 0x17a   :  { %v975_v0 = vadd.f32 %v2114_v32, %v871_v11 }
 0x18d   :  { %v2147_v43 = vpop.f32.mrb[6].mxu0 }
 0x18e   :  { %v2148_v12 = vpop.f32.mrb[7].mxu0 }
 0x18f   :  { %v2149_v7 = vadd.f32 %v2148_v12, %v2147_v43 }
 0x191   :  { %v1087_v33 = vadd.f32 %v2149_v7, %v975_v0 }
 0x196   :  { %v2182_v21 = vpop.f32.mrb[6].mxu1 }
 0x197   :  { %v2183_v25 = vpop.f32.mrb[7].mxu1 }
 0x198   :  { %v2184_v2 = vadd.f32 %v2183_v25, %v2182_v21 }
 0x19a   :  { %v1319_v57 = vadd.f32 %v2184_v2, %v1087_v33 }
 0x1ad   :  { %v2217_v40 = vpop.f32.mrb[8].mxu0 }
 0x1ae   :  { %v2218_v45 = vpop.f32.mrb[9].mxu0 }
 0x1af   :  { %v2219_v38 = vadd.f32 %v2218_v45, %v2217_v40 }
 0x1b1   :  { %v1457_v34 = vadd.f32 %v2219_v38, %v1319_v57 }
 0x1b6   :  { %v2252_v15 = vpop.f32.mrb[8].mxu1 }
 0x1b7   :  { %v2253_v3 = vpop.f32.mrb[9].mxu1 }
 0x1b8   :  { %v2254_v63 = vadd.f32 %v2253_v3, %v2252_v15 }
 0x1ba   :  { %v1565_v60 = vadd.f32 %v2254_v63, %v1457_v34 }
 0x1cd   :  { %v2287_v10 = vpop.f32.mrb[10].mxu0 }
 0x1ce   :  { %v2288_v26 = vpop.f32.mrb[11].mxu0 }
 0x1cf   :  { %v2289_v9 = vadd.f32 %v2288_v26, %v2287_v10 }
 0x1d1   :  { %v1733_v19 = vadd.f32 %v2289_v9, %v1565_v60 }
 0x1d6   :  { %v2322_v14 = vpop.f32.mrb[10].mxu1 }
 0x1d7   :  { %v2323_v46 = vpop.f32.mrb[11].mxu1 }
 0x1d8   :  { %v2324_v18 = vadd.f32 %v2323_v46, %v2322_v14 }
 0x1da   :  { %v1837_v35 = vadd.f32 %v2324_v18, %v1733_v19 }
 0x1dc   :  { %1844 = vrot.lane.b32.xlu0 %v1837_v35, %s2797_s2 }
 0x1e0   :  { %1862 = vrot.lane.b32.xlu0 %v1837_v35, %s2798_s11 }
 0x24e   :  { %v1845_v5 = vpop.permute.xlu0 %1844 }
 0x24f   :  { %v1846_v30 = vsel %vm1843_vm0, %v1845_v5, -inf }
 0x250   :  { %1847 = vrot.lane.b32.xlu1 %v1846_v30, %s2797_s2 }
 0x252   :  { %v1863_v52 = vpop.permute.xlu0 %1862 }
 0x253   :  { %v1864_v24 = vsel %vm1861_vm1, %v1863_v52, -inf }
 0x254   :  { %1867 = vrot.lane.b32.xlu1 %v1864_v24, %s2798_s11 }
 0x2c2   :  { %v1848_v8 = vpop.permute.xlu1 %1847 }
 0x2c3   :  { %v1849_v44 = vsel %vm1843_vm0, %v1848_v8, -inf }
 0x2c4   :  { %v1850_v16 = vmax.f32 %v1846_v30, %v1849_v44 }
 0x2c6   :  { %1852 = vrot.lane.b32.xlu0 %v1850_v16, %s2799_s12  ;;  %v1868_v51 = vpop.permute.xlu1 %1867 }
 0x2c7   :  { %v1869_v62 = vsel %vm1866_vm2, %v1868_v51, -inf }
 0x2c8   :  { %v1870_v6 = vmax.f32 %v1864_v24, %v1869_v62 }
 0x2ca   :  { %1873 = vrot.lane.b32.xlu1 %v1870_v6, %s2800_s13 }
 0x338   :  { %v1853_v36 = vpop.permute.xlu0 %1852 }
 0x339   :  { %v1854_v1 = vsel %vm1851_vm3, %v1853_v36, -inf }
 0x33a   :  { %v1855_v61 = vmax.f32 %v1850_v16, %v1854_v1 }
 0x33c   :  { %v1874_v58 = vpop.permute.xlu1 %1873  ;;  %1857 = vrot.lane.b32.xlu0 %v1855_v61, %s2801_s14 }
 0x33d   :  { %v1875_v20 = vsel %vm1872_vm4, %v1874_v58, -inf }
 0x33e   :  { %v1876_v41 = vmax.f32 %v1870_v6, %v1875_v20 }
 0x340   :  { %1879 = vrot.lane.b32.xlu1 %v1876_v41, %s2802_s15 }
 0x3ae   :  { %v1858_v48 = vpop.permute.xlu0 %1857 }
 0x3af   :  { %v1859_v54 = vsel %vm1856_vm5, %v1858_v48, -inf }
 0x3b0   :  { %v1860_v59 = vmax.f32 %v1855_v61, %v1859_v54 }
 0x3b2   :  { %v1880_v13 = vpop.permute.xlu1 %1879  ;;  %vm1883_vm7 = vcmp.gt.f32.partialorder %v1837_v35, %v1860_v59 }
 0x3b3   :  { %v1881_v53 = vsel %vm1878_vm6, %v1880_v13, -inf }
 0x3b4   :  { %v1882_v22 = vmax.f32 %v1876_v41, %v1881_v53 }
 0x3b6   :  { %vm1884_vm8 = vcmp.ge.f32.partialorder %v1837_v35, %v1882_v22 }
 0x3b7   :  { %vm1885_vm9 = vmand %vm1883_vm7, %vm1884_vm8 }
 0x3b8   :  { %v1886_v50 = vsel %vm1885_vm9, 1.0, %v2804_v47 }
 0x3b9   :  { %1887 = vst [vmem:[#allocation7] sm:$0xff] %v1886_v50 }
 0x3ba   :  { %2776 = shalt.err (!%p2773_p6)
}
 0x3bb   :  { %s2777_s21 = scalar_lea.hbm %s3743_s3, 128 }
 0x3bc   :  { %p2778_p7 = scmp.ne.s32.totalorder %s3743_s3, %s2777_s21  ;;  %p2781_p8 = scmp.lt.u32.totalorder %s2777_s21, %s3743_s3 }
 0x3be   :  { %p2783_p9 = pnand %p2781_p8, %p2778_p7 }
 0x3c0   :  { %2786 = shalt.err (!%p2783_p9)
}
 0x3c1   :  { %1897 = dma.vmem_to_hbm [thread:$0]  %s1895_s17, 128, %s3743_s3, [#allocation4]  }
 0x3c2   :  { %2791 = dma.done.wait [#allocation4], 128  }
 0x3c3   :  { %2792 = vsyncadd [#allocation4], 4294967168 }
 0x3c4   :  { %1901 = vsyncpa [#allocation3], 1 }
 0x3c5   :  { %1902 = vsyncpa [#allocation6], 1 }
 0x3c6   :  { %1903 = vsyncpa [#allocation4], 1 }

</bundles_post_ra>
